<compile_context>
chip_gen: v7x
topology: tpu7x:2x2x1
jax: 0.10.0
libtpu: 0.0.40
codegen_flags: <defaults>
</compile_context>

<pallas_src>
import functools

import jax
import jax.numpy as jnp
from jax.experimental import pallas as pl
from jax.experimental.pallas import tpu as pltpu

LANE = 128


def _round_up(x, m):
    return ((x + m - 1) // m) * m


# ----------------------------- Pallas kernels ------------------------------

def _gemm_kernel(p_ref, w_ref, b_ref, o_ref, *, relu):
    """(TM,K)x(K,C) bf16 matmul -> f32 acc + bias + optional ReLU."""
    acc = jnp.dot(p_ref[...], w_ref[...], preferred_element_type=jnp.float32)
    y = acc + b_ref[...]
    if relu:
        y = jnp.maximum(y, 0.0)
    o_ref[...] = y.astype(o_ref.dtype)


def _gemm_res_kernel(p_ref, w_ref, b_ref, r_ref, o_ref, *, relu):
    """matmul + bias + residual add + optional ReLU."""
    acc = jnp.dot(p_ref[...], w_ref[...], preferred_element_type=jnp.float32)
    y = acc + b_ref[...] + r_ref[...].astype(jnp.float32)
    if relu:
        y = jnp.maximum(y, 0.0)
    o_ref[...] = y.astype(o_ref.dtype)


def _gemm_colmask_kernel(p_ref, w_ref, b_ref, m_ref, o_ref):
    """matmul + bias; ReLU applied only on columns where mask > 0.

    Used for the fused (3x3-main || 1x1-projection) branch GEMM of the
    stride-2 BasicBlock.
    """
    acc = jnp.dot(p_ref[...], w_ref[...], preferred_element_type=jnp.float32)
    y = acc + b_ref[...]
    o_ref[...] = jnp.where(m_ref[...] > 0.0, jnp.maximum(y, 0.0), y).astype(
        o_ref.dtype)


def _gemm_res_relu_gap_kernel(p_ref, w_ref, b_ref, r_ref, o_ref, *, inv_hw):
    """Final conv: matmul + bias + residual + ReLU, then spatial mean.

    One grid step per image; p_ref holds that image's HW patch rows, and the
    epilogue reduces them so no separate GAP kernel / HBM round-trip is needed.
    """
    acc = jnp.dot(p_ref[...], w_ref[...], preferred_element_type=jnp.float32)
    y = jnp.maximum(acc + b_ref[...] + r_ref[...].astype(jnp.float32), 0.0)
    pooled = jnp.sum(y, axis=0, keepdims=True) * inv_hw          # (1, Cp)
    o_ref[...] = pooled.reshape(1, 1, -1).astype(o_ref.dtype)


# ------------------------------ Pallas wrappers -----------------------------

def _m_tiling(m, max_tm=512):
    """Pad M and pick a tile so the grid has exactly 2 parallel steps
    (both v7x TensorCores busy) unless the tile would exceed max_tm."""
    mp = _round_up(m, 16)
    if mp // 2 <= max_tm:
        return mp, mp // 2, 2
    mp = _round_up(m, 2 * max_tm)
    return mp, max_tm, mp // max_tm


def fused_gemm(patches, wmat, bias, *, residual=None, relu=True,
               relu_mask=None):
    """y = act(patches @ wmat + bias [+ residual]) with TPU-friendly padding.

    patches: (M, K) f32; wmat: (K, C) f32 (BN scale already folded in);
    bias: (C,) f32; residual: optional (M, C); relu_mask: optional (C,) f32
    (per-column ReLU select, overrides `relu`).  Returns (M, C) f32.
    Operands are cast to bf16; accumulation and epilogue stay f32.
    """
    assert not (residual is not None and relu_mask is not None)
    m, k = patches.shape
    c = wmat.shape[1]
    kp, cp = _round_up(k, LANE), _round_up(c, LANE)
    mp, tm, steps = _m_tiling(m)

    p = jnp.pad(patches.astype(jnp.bfloat16), ((0, mp - m), (0, kp - k)))
    w = jnp.pad(wmat.astype(jnp.bfloat16), ((0, kp - k), (0, cp - c)))
    b = jnp.pad(bias.astype(jnp.float32).reshape(1, c), ((0, 0), (0, cp - c)))

    in_specs = [
        pl.BlockSpec((tm, kp), lambda i: (i, 0)),     # patch tile
        pl.BlockSpec((kp, cp), lambda i: (0, 0)),     # full (scaled) weight
        pl.BlockSpec((1, cp), lambda i: (0, 0)),      # folded-BN bias
    ]
    args = [p, w, b]

    if relu_mask is not None:
        msk = jnp.pad(relu_mask.astype(jnp.float32).reshape(1, c),
                      ((0, 0), (0, cp - c)))
        in_specs.append(pl.BlockSpec((1, cp), lambda i: (0, 0)))
        args.append(msk)
        kernel = _gemm_colmask_kernel
    elif residual is not None:
        r = jnp.pad(residual.astype(jnp.bfloat16),
                    ((0, mp - m), (0, cp - c)))
        in_specs.append(pl.BlockSpec((tm, cp), lambda i: (i, 0)))
        args.append(r)
        kernel = functools.partial(_gemm_res_kernel, relu=relu)
    else:
        kernel = functools.partial(_gemm_kernel, relu=relu)

    y = pl.pallas_call(
        kernel,
        out_shape=jax.ShapeDtypeStruct((mp, cp), jnp.float32),
        grid=(steps,),
        in_specs=in_specs,
        out_specs=pl.BlockSpec((tm, cp), lambda i: (i, 0)),
        compiler_params=pltpu.CompilerParams(
            dimension_semantics=("parallel",)),
    )(*args)
    return y[:m, :c]


def fused_gemm_res_relu_gap(patches, wmat, bias, residual, *, n_images, hw):
    """Final conv + residual + ReLU with the global average pool fused into
    the kernel epilogue.  Grid = one step per image.  Returns (n_images, C)."""
    m, k = patches.shape
    c = wmat.shape[1]
    assert m == n_images * hw and hw % 8 == 0
    kp, cp = _round_up(k, LANE), _round_up(c, LANE)

    p = jnp.pad(patches.astype(jnp.bfloat16), ((0, 0), (0, kp - k)))
    w = jnp.pad(wmat.astype(jnp.bfloat16), ((0, kp - k), (0, cp - c)))
    b = jnp.pad(bias.astype(jnp.float32).reshape(1, c), ((0, 0), (0, cp - c)))
    r = jnp.pad(residual.astype(jnp.bfloat16), ((0, 0), (0, cp - c)))

    pooled = pl.pallas_call(
        functools.partial(_gemm_res_relu_gap_kernel, inv_hw=1.0 / hw),
        out_shape=jax.ShapeDtypeStruct((n_images, 1, cp), jnp.float32),
        grid=(n_images,),
        in_specs=[
            pl.BlockSpec((hw, kp), lambda n: (n, 0)),
            pl.BlockSpec((kp, cp), lambda n: (0, 0)),
            pl.BlockSpec((1, cp), lambda n: (0, 0)),
            pl.BlockSpec((hw, cp), lambda n: (n, 0)),
        ],
        out_specs=pl.BlockSpec((1, 1, cp), lambda n: (n, 0, 0)),
        compiler_params=pltpu.CompilerParams(
            dimension_semantics=("parallel",)),
    )(p, w, b, r)
    return pooled[:, 0, :c]


# ------------------------------- JAX glue -----------------------------------

def _im2col_3x3(x_nhwc, stride):
    """3x3, pad=1 im2col.  Patch feature ordering is (ky, kx, cin)."""
    n, h, w, c = x_nhwc.shape
    ho = (h + 2 - 3) // stride + 1
    wo = (w + 2 - 3) // stride + 1
    xp = jnp.pad(x_nhwc, ((0, 0), (1, 1), (1, 1), (0, 0)))
    cols = []
    for ky in range(3):
        for kx in range(3):
            cols.append(xp[:, ky:ky + (ho - 1) * stride + 1:stride,
                           kx:kx + (wo - 1) * stride + 1:stride, :])
    patches = jnp.stack(cols, axis=3)            # (n, ho, wo, 9, c)
    return patches.reshape(n * ho * wo, 9 * c), (n, ho, wo)


def _w3x3_mat(w, scale):
    """Torch (Cout,Cin,3,3) -> BN-scale-folded (9*Cin, Cout) GEMM matrix."""
    cout = w.shape[0]
    return jnp.transpose(w, (2, 3, 1, 0)).reshape(-1, cout) * scale[None, :]


def _w1x1_as_3x3_mat(w, scale):
    """Torch (Cout,Cin,1,1) embedded as the centre tap of a 3x3 kernel so a
    stride-2 / pad-1 3x3 im2col GEMM reproduces the stride-2 1x1 conv."""
    cout, cin = w.shape[0], w.shape[1]
    w11 = w.reshape(cout, cin).T                                 # (Cin, Cout)
    wk = jnp.zeros((3, 3, cin, cout), w.dtype).at[1, 1].set(w11)
    return wk.reshape(9 * cin, cout) * scale[None, :]


# --------------------------- parameters (synthetic) --------------------------

def _bn_fold(key, c, eps=1e-5):
    """Eval-mode BatchNorm folded into a (scale, bias) pair."""
    k1, k2, k3, k4 = jax.random.split(key, 4)
    gamma = 1.0 + 0.1 * jax.random.normal(k1, (c,))
    beta = 0.1 * jax.random.normal(k2, (c,))
    mean = 0.1 * jax.random.normal(k3, (c,))
    var = 1.0 + 0.1 * jnp.abs(jax.random.normal(k4, (c,)))
    scale = gamma / jnp.sqrt(var + eps)
    bias = beta - mean * scale
    return scale.astype(jnp.float32), bias.astype(jnp.float32)


def init_params(key, c_in=3, c1=16, c2=32):
    keys = jax.random.split(key, 12)
    p = {}
    p["conv1_w"] = 0.1 * jax.random.normal(keys[0], (c1, c_in, 3, 3))
    p["bn1_s"], p["bn1_b"] = _bn_fold(keys[1], c1)
    # BasicBlock 1: c1 -> c1, stride 1
    p["b1c1_w"] = 0.1 * jax.random.normal(keys[2], (c1, c1, 3, 3))
    p["b1bn1_s"], p["b1bn1_b"] = _bn_fold(keys[3], c1)
    p["b1c2_w"] = 0.1 * jax.random.normal(keys[4], (c1, c1, 3, 3))
    p["b1bn2_s"], p["b1bn2_b"] = _bn_fold(keys[5], c1)
    # BasicBlock 2: c1 -> c2, stride 2 (with 1x1 downsample)
    p["b2c1_w"] = 0.1 * jax.random.normal(keys[6], (c2, c1, 3, 3))
    p["b2bn1_s"], p["b2bn1_b"] = _bn_fold(keys[7], c2)
    p["b2c2_w"] = 0.1 * jax.random.normal(keys[8], (c2, c2, 3, 3))
    p["b2bn2_s"], p["b2bn2_b"] = _bn_fold(keys[9], c2)
    p["b2ds_w"] = 0.1 * jax.random.normal(keys[10], (c2, c1, 1, 1))
    p["b2dsbn_s"], p["b2dsbn_b"] = _bn_fold(keys[11], c2)
    return {k: v.astype(jnp.float32) for k, v in p.items()}


# ------------------------------- forward pass --------------------------------

def resnet_features_forward(x_nchw, p):
    """Equivalent of ResNet_features.forward: all layers except the final FC.

    Input:  (N, 3, H, W)  NCHW float32  (PyTorch convention)
    Output: (N, C2, 1, 1) NCHW float32
    """
    x = jnp.transpose(x_nchw, (0, 2, 3, 1)).astype(jnp.float32)   # -> NHWC
    n = x.shape[0]

    # stem: conv3x3 + BN + ReLU (CIFAR-style stem, no maxpool)
    patches, (_, ho, wo) = _im2col_3x3(x, stride=1)
    c1 = p["conv1_w"].shape[0]
    x1f = fused_gemm(patches, _w3x3_mat(p["conv1_w"], p["bn1_s"]),
                     p["bn1_b"], relu=True)                        # (M1, c1)

    # BasicBlock 1 (identity shortcut)
    patches, _ = _im2col_3x3(x1f.reshape(n, ho, wo, c1), stride=1)
    hf = fused_gemm(patches, _w3x3_mat(p["b1c1_w"], p["b1bn1_s"]),
                    p["b1bn1_b"], relu=True)
    patches, _ = _im2col_3x3(hf.reshape(n, ho, wo, c1), stride=1)
    x2f = fused_gemm(patches, _w3x3_mat(p["b1c2_w"], p["b1bn2_s"]),
                     p["b1bn2_b"], residual=x1f, relu=True)

    # BasicBlock 2: the two stride-2 branches share one GEMM (lane-dense Cout)
    c2 = p["b2c1_w"].shape[0]
    patches, (_, ho2, wo2) = _im2col_3x3(x2f.reshape(n, ho, wo, c1), stride=2)
    w_fused = jnp.concatenate(
        [_w3x3_mat(p["b2c1_w"], p["b2bn1_s"]),            # main branch (ReLU)
         _w1x1_as_3x3_mat(p["b2ds_w"], p["b2dsbn_s"])],   # projection (no ReLU)
        axis=1)                                           # (9*c1, 2*c2)
    b_fused = jnp.concatenate([p["b2bn1_b"], p["b2dsbn_b"]])
    relu_mask = jnp.concatenate([jnp.ones((c2,), jnp.float32),
                                 jnp.zeros((c2,), jnp.float32)])
    both = fused_gemm(patches, w_fused, b_fused, relu_mask=relu_mask)
    h2f, dsf = both[:, :c2], both[:, c2:]

    # final conv of block 2 + projection residual + ReLU + fused global avgpool
    patches, _ = _im2col_3x3(h2f.reshape(n, ho2, wo2, c2), stride=1)
    pooled = fused_gemm_res_relu_gap(
        patches, _w3x3_mat(p["b2c2_w"], p["b2bn2_s"]), p["b2bn2_b"], dsf,
        n_images=n, hw=ho2 * wo2)                         # (n, c2)
    return pooled[:, :, None, None]                       # (n, c2, 1, 1)


# ---------------------------------- main -------------------------------------

if __name__ == "__main__":
    key = jax.random.PRNGKey(0)
    pkey, xkey = jax.random.split(key)
    params = init_params(pkey)

    # small input consistent with a CIFAR-style ResNet: N=2, C=3, 16x16
    x = jax.random.normal(xkey, (2, 3, 16, 16), dtype=jnp.float32)

    fwd = jax.jit(lambda inp: resnet_features_forward(inp, params))
    out = fwd(x)
    jax.block_until_ready(out)

    assert out.shape == (2, 32, 1, 1), out.shape
    assert out.dtype == jnp.float32
    assert bool(jnp.all(jnp.isfinite(out)))
    print("KERNEL_OK")
</pallas_src>

<mosaic_0001>
module attributes {stable_mosaic.version = 11 : i64} {
  func.func @_gemm_kernel(%arg0: i32, %arg1: memref<256x128xbf16, #tpu.memory_space<vmem>>, %arg2: memref<128x128xbf16, #tpu.memory_space<vmem>>, %arg3: memref<1x128xf32, #tpu.memory_space<vmem>>, %arg4: memref<256x128xf32, #tpu.memory_space<vmem>>) attributes {dimension_semantics = [#tpu.dimension_semantics<parallel>], iteration_bounds = array<i64: 2>, scalar_prefetch = 0 : i64, scratch_operands = 0 : i64, tpu.core_type = #tpu.core_type<tc>, window_params = [{transform_indices = @transform_0, window_bounds = array<i64: 256, 128>}, {pipeline_mode = #tpu.pipeline_mode<synchronous>, transform_indices = @transform_1, window_bounds = array<i64: 128, 128>}, {pipeline_mode = #tpu.pipeline_mode<synchronous>, transform_indices = @transform_2, window_bounds = array<i64: 1, 128>}, {transform_indices = @transform_3, window_bounds = array<i64: 256, 128>}]} {
    %c0 = arith.constant 0 : index
    %c0_0 = arith.constant 0 : index
    %0 = vector.load %arg1[%c0, %c0_0] : memref<256x128xbf16, #tpu.memory_space<vmem>>, vector<256x128xbf16>
    %c0_1 = arith.constant 0 : index
    %c0_2 = arith.constant 0 : index
    %1 = vector.load %arg2[%c0_1, %c0_2] : memref<128x128xbf16, #tpu.memory_space<vmem>>, vector<128x128xbf16>
    %cst = arith.constant dense<0.000000e+00> : vector<256x128xf32>
    %2 = tpu.matmul %0, %1, %cst {dimension_numbers = #tpu.dot_dimension_numbers<[1], [0], [0], [1], [0, 0, 1, 1], [], []>} : vector<256x128xbf16>, vector<128x128xbf16>, vector<256x128xf32> -> vector<256x128xf32>
    %c0_3 = arith.constant 0 : index
    %c0_4 = arith.constant 0 : index
    %3 = vector.load %arg3[%c0_3, %c0_4] : memref<1x128xf32, #tpu.memory_space<vmem>>, vector<1x128xf32>
    %4 = vector.broadcast %3 : vector<1x128xf32> to vector<256x128xf32>
    %5 = arith.addf %2, %4 : vector<256x128xf32>
    %cst_5 = arith.constant 0.000000e+00 : f32
    %6 = vector.broadcast %cst_5 : f32 to vector<256x128xf32>
    %7 = arith.maximumf %5, %6 : vector<256x128xf32>
    %c0_6 = arith.constant 0 : index
    %c0_7 = arith.constant 0 : index
    %8 = vector.load %arg4[%c0_6, %c0_7] : memref<256x128xf32, #tpu.memory_space<vmem>>, vector<256x128xf32>
    tpu.vector_store %arg4[%c0_6, %c0_7], %7 {strides = array<i32>} : memref<256x128xf32, #tpu.memory_space<vmem>>, vector<256x128xf32>,
    return
  }
  func.func @transform_0(%arg0: i32) -> (i32, i32) {
    %c0_i32 = arith.constant 0 : i32
    %c0_i32_0 = arith.constant 0 : i32
    return %arg0, %c0_i32 : i32, i32
  }
  func.func @transform_1(%arg0: i32) -> (i32, i32) {
    %c0_i32 = arith.constant 0 : i32
    %c0_i32_0 = arith.constant 0 : i32
    %c0_i32_1 = arith.constant 0 : i32
    return %c0_i32, %c0_i32_0 : i32, i32
  }
  func.func @transform_2(%arg0: i32) -> (i32, i32) {
    %c0_i32 = arith.constant 0 : i32
    %c0_i32_0 = arith.constant 0 : i32
    %c0_i32_1 = arith.constant 0 : i32
    return %c0_i32, %c0_i32_0 : i32, i32
  }
  func.func @transform_3(%arg0: i32) -> (i32, i32) {
    %c0_i32 = arith.constant 0 : i32
    %c0_i32_0 = arith.constant 0 : i32
    return %arg0, %c0_i32 : i32, i32
  }
}

module attributes {stable_mosaic.version = 11 : i64} {
  func.func @_gemm_kernel(%arg0: i32, %arg1: memref<256x256xbf16, #tpu.memory_space<vmem>>, %arg2: memref<256x128xbf16, #tpu.memory_space<vmem>>, %arg3: memref<1x128xf32, #tpu.memory_space<vmem>>, %arg4: memref<256x128xf32, #tpu.memory_space<vmem>>) attributes {dimension_semantics = [#tpu.dimension_semantics<parallel>], iteration_bounds = array<i64: 2>, scalar_prefetch = 0 : i64, scratch_operands = 0 : i64, tpu.core_type = #tpu.core_type<tc>, window_params = [{transform_indices = @transform_0, window_bounds = array<i64: 256, 256>}, {pipeline_mode = #tpu.pipeline_mode<synchronous>, transform_indices = @transform_1, window_bounds = array<i64: 256, 128>}, {pipeline_mode = #tpu.pipeline_mode<synchronous>, transform_indices = @transform_2, window_bounds = array<i64: 1, 128>}, {transform_indices = @transform_3, window_bounds = array<i64: 256, 128>}]} {
    %c0 = arith.constant 0 : index
    %c0_0 = arith.constant 0 : index
    %0 = vector.load %arg1[%c0, %c0_0] : memref<256x256xbf16, #tpu.memory_space<vmem>>, vector<256x256xbf16>
    %c0_1 = arith.constant 0 : index
    %c0_2 = arith.constant 0 : index
    %1 = vector.load %arg2[%c0_1, %c0_2] : memref<256x128xbf16, #tpu.memory_space<vmem>>, vector<256x128xbf16>
    %cst = arith.constant dense<0.000000e+00> : vector<256x128xf32>
    %2 = tpu.matmul %0, %1, %cst {dimension_numbers = #tpu.dot_dimension_numbers<[1], [0], [0], [1], [0, 0, 1, 1], [], []>} : vector<256x256xbf16>, vector<256x128xbf16>, vector<256x128xf32> -> vector<256x128xf32>
    %c0_3 = arith.constant 0 : index
    %c0_4 = arith.constant 0 : index
    %3 = vector.load %arg3[%c0_3, %c0_4] : memref<1x128xf32, #tpu.memory_space<vmem>>, vector<1x128xf32>
    %4 = vector.broadcast %3 : vector<1x128xf32> to vector<256x128xf32>
    %5 = arith.addf %2, %4 : vector<256x128xf32>
    %cst_5 = arith.constant 0.000000e+00 : f32
    %6 = vector.broadcast %cst_5 : f32 to vector<256x128xf32>
    %7 = arith.maximumf %5, %6 : vector<256x128xf32>
    %c0_6 = arith.constant 0 : index
    %c0_7 = arith.constant 0 : index
    %8 = vector.load %arg4[%c0_6, %c0_7] : memref<256x128xf32, #tpu.memory_space<vmem>>, vector<256x128xf32>
    tpu.vector_store %arg4[%c0_6, %c0_7], %7 {strides = array<i32>} : memref<256x128xf32, #tpu.memory_space<vmem>>, vector<256x128xf32>,
    return
  }
  func.func @transform_0(%arg0: i32) -> (i32, i32) {
    %c0_i32 = arith.constant 0 : i32
    %c0_i32_0 = arith.constant 0 : i32
    return %arg0, %c0_i32 : i32, i32
  }
  func.func @transform_1(%arg0: i32) -> (i32, i32) {
    %c0_i32 = arith.constant 0 : i32
    %c0_i32_0 = arith.constant 0 : i32
    %c0_i32_1 = arith.constant 0 : i32
    return %c0_i32, %c0_i32_0 : i32, i32
  }
  func.func @transform_2(%arg0: i32) -> (i32, i32) {
    %c0_i32 = arith.constant 0 : i32
    %c0_i32_0 = arith.constant 0 : i32
    %c0_i32_1 = arith.constant 0 : i32
    return %c0_i32, %c0_i32_0 : i32, i32
  }
  func.func @transform_3(%arg0: i32) -> (i32, i32) {
    %c0_i32 = arith.constant 0 : i32
    %c0_i32_0 = arith.constant 0 : i32
    return %arg0, %c0_i32 : i32, i32
  }
}

module attributes {stable_mosaic.version = 11 : i64} {
  func.func @_gemm_res_kernel(%arg0: i32, %arg1: memref<256x256xbf16, #tpu.memory_space<vmem>>, %arg2: memref<256x128xbf16, #tpu.memory_space<vmem>>, %arg3: memref<1x128xf32, #tpu.memory_space<vmem>>, %arg4: memref<256x128xbf16, #tpu.memory_space<vmem>>, %arg5: memref<256x128xf32, #tpu.memory_space<vmem>>) attributes {dimension_semantics = [#tpu.dimension_semantics<parallel>], iteration_bounds = array<i64: 2>, scalar_prefetch = 0 : i64, scratch_operands = 0 : i64, tpu.core_type = #tpu.core_type<tc>, window_params = [{transform_indices = @transform_0, window_bounds = array<i64: 256, 256>}, {pipeline_mode = #tpu.pipeline_mode<synchronous>, transform_indices = @transform_1, window_bounds = array<i64: 256, 128>}, {pipeline_mode = #tpu.pipeline_mode<synchronous>, transform_indices = @transform_2, window_bounds = array<i64: 1, 128>}, {transform_indices = @transform_3, window_bounds = array<i64: 256, 128>}, {transform_indices = @transform_4, window_bounds = array<i64: 256, 128>}]} {
    %c0 = arith.constant 0 : index
    %c0_0 = arith.constant 0 : index
    %0 = vector.load %arg1[%c0, %c0_0] : memref<256x256xbf16, #tpu.memory_space<vmem>>, vector<256x256xbf16>
    %c0_1 = arith.constant 0 : index
    %c0_2 = arith.constant 0 : index
    %1 = vector.load %arg2[%c0_1, %c0_2] : memref<256x128xbf16, #tpu.memory_space<vmem>>, vector<256x128xbf16>
    %cst = arith.constant dense<0.000000e+00> : vector<256x128xf32>
    %2 = tpu.matmul %0, %1, %cst {dimension_numbers = #tpu.dot_dimension_numbers<[1], [0], [0], [1], [0, 0, 1, 1], [], []>} : vector<256x256xbf16>, vector<256x128xbf16>, vector<256x128xf32> -> vector<256x128xf32>
    %c0_3 = arith.constant 0 : index
    %c0_4 = arith.constant 0 : index
    %3 = vector.load %arg3[%c0_3, %c0_4] : memref<1x128xf32, #tpu.memory_space<vmem>>, vector<1x128xf32>
    %4 = vector.broadcast %3 : vector<1x128xf32> to vector<256x128xf32>
    %5 = arith.addf %2, %4 : vector<256x128xf32>
    %c0_5 = arith.constant 0 : index
    %c0_6 = arith.constant 0 : index
    %6 = vector.load %arg4[%c0_5, %c0_6] : memref<256x128xbf16, #tpu.memory_space<vmem>>, vector<256x128xbf16>
    %7 = arith.extf %6 : vector<256x128xbf16> to vector<256x128xf32>
    %8 = arith.addf %5, %7 : vector<256x128xf32>
    %cst_7 = arith.constant 0.000000e+00 : f32
    %9 = vector.broadcast %cst_7 : f32 to vector<256x128xf32>
    %10 = arith.maximumf %8, %9 : vector<256x128xf32>
    %c0_8 = arith.constant 0 : index
    %c0_9 = arith.constant 0 : index
    %11 = vector.load %arg5[%c0_8, %c0_9] : memref<256x128xf32, #tpu.memory_space<vmem>>, vector<256x128xf32>
    tpu.vector_store %arg5[%c0_8, %c0_9], %10 {strides = array<i32>} : memref<256x128xf32, #tpu.memory_space<vmem>>, vector<256x128xf32>,
    return
  }
  func.func @transform_0(%arg0: i32) -> (i32, i32) {
    %c0_i32 = arith.constant 0 : i32
    %c0_i32_0 = arith.constant 0 : i32
    return %arg0, %c0_i32 : i32, i32
  }
  func.func @transform_1(%arg0: i32) -> (i32, i32) {
    %c0_i32 = arith.constant 0 : i32
    %c0_i32_0 = arith.constant 0 : i32
    %c0_i32_1 = arith.constant 0 : i32
    return %c0_i32, %c0_i32_0 : i32, i32
  }
  func.func @transform_2(%arg0: i32) -> (i32, i32) {
    %c0_i32 = arith.constant 0 : i32
    %c0_i32_0 = arith.constant 0 : i32
    %c0_i32_1 = arith.constant 0 : i32
    return %c0_i32, %c0_i32_0 : i32, i32
  }
  func.func @transform_3(%arg0: i32) -> (i32, i32) {
    %c0_i32 = arith.constant 0 : i32
    %c0_i32_0 = arith.constant 0 : i32
    return %arg0, %c0_i32 : i32, i32
  }
  func.func @transform_4(%arg0: i32) -> (i32, i32) {
    %c0_i32 = arith.constant 0 : i32
    %c0_i32_0 = arith.constant 0 : i32
    return %arg0, %c0_i32 : i32, i32
  }
}

module attributes {stable_mosaic.version = 11 : i64} {
  func.func @_gemm_colmask_kernel(%arg0: i32, %arg1: memref<64x256xbf16, #tpu.memory_space<vmem>>, %arg2: memref<256x128xbf16, #tpu.memory_space<vmem>>, %arg3: memref<1x128xf32, #tpu.memory_space<vmem>>, %arg4: memref<1x128xf32, #tpu.memory_space<vmem>>, %arg5: memref<64x128xf32, #tpu.memory_space<vmem>>) attributes {dimension_semantics = [#tpu.dimension_semantics<parallel>], iteration_bounds = array<i64: 2>, scalar_prefetch = 0 : i64, scratch_operands = 0 : i64, tpu.core_type = #tpu.core_type<tc>, window_params = [{transform_indices = @transform_0, window_bounds = array<i64: 64, 256>}, {pipeline_mode = #tpu.pipeline_mode<synchronous>, transform_indices = @transform_1, window_bounds = array<i64: 256, 128>}, {pipeline_mode = #tpu.pipeline_mode<synchronous>, transform_indices = @transform_2, window_bounds = array<i64: 1, 128>}, {pipeline_mode = #tpu.pipeline_mode<synchronous>, transform_indices = @transform_3, window_bounds = array<i64: 1, 128>}, {transform_indices = @transform_4, window_bounds = array<i64: 64, 128>}]} {
    %c0 = arith.constant 0 : index
    %c0_0 = arith.constant 0 : index
    %0 = vector.load %arg1[%c0, %c0_0] : memref<64x256xbf16, #tpu.memory_space<vmem>>, vector<64x256xbf16>
    %c0_1 = arith.constant 0 : index
    %c0_2 = arith.constant 0 : index
    %1 = vector.load %arg2[%c0_1, %c0_2] : memref<256x128xbf16, #tpu.memory_space<vmem>>, vector<256x128xbf16>
    %cst = arith.constant dense<0.000000e+00> : vector<64x128xf32>
    %2 = tpu.matmul %0, %1, %cst {dimension_numbers = #tpu.dot_dimension_numbers<[1], [0], [0], [1], [0, 0, 1, 1], [], []>} : vector<64x256xbf16>, vector<256x128xbf16>, vector<64x128xf32> -> vector<64x128xf32>
    %c0_3 = arith.constant 0 : index
    %c0_4 = arith.constant 0 : index
    %3 = vector.load %arg3[%c0_3, %c0_4] : memref<1x128xf32, #tpu.memory_space<vmem>>, vector<1x128xf32>
    %4 = vector.broadcast %3 : vector<1x128xf32> to vector<64x128xf32>
    %5 = arith.addf %2, %4 : vector<64x128xf32>
    %c0_5 = arith.constant 0 : index
    %c0_6 = arith.constant 0 : index
    %6 = vector.load %arg4[%c0_5, %c0_6] : memref<1x128xf32, #tpu.memory_space<vmem>>, vector<1x128xf32>
    %cst_7 = arith.constant 0.000000e+00 : f32
    %7 = vector.broadcast %cst_7 : f32 to vector<1x128xf32>
    %8 = arith.cmpf ogt, %6, %7 : vector<1x128xf32>
    %cst_8 = arith.constant 0.000000e+00 : f32
    %9 = vector.broadcast %cst_8 : f32 to vector<64x128xf32>
    %10 = arith.maximumf %5, %9 : vector<64x128xf32>
    %11 = vector.shape_cast %8 : vector<1x128xi1> to vector<1x128xi1>
    %12 = vector.broadcast %11 : vector<1x128xi1> to vector<64x128xi1>
    %13 = arith.select %12, %10, %5 : vector<64x128xi1>, vector<64x128xf32>
    %c0_9 = arith.constant 0 : index
    %c0_10 = arith.constant 0 : index
    %14 = vector.load %arg5[%c0_9, %c0_10] : memref<64x128xf32, #tpu.memory_space<vmem>>, vector<64x128xf32>
    tpu.vector_store %arg5[%c0_9, %c0_10], %13 {strides = array<i32>} : memref<64x128xf32, #tpu.memory_space<vmem>>, vector<64x128xf32>,
    return
  }
  func.func @transform_0(%arg0: i32) -> (i32, i32) {
    %c0_i32 = arith.constant 0 : i32
    %c0_i32_0 = arith.constant 0 : i32
    return %arg0, %c0_i32 : i32, i32
  }
  func.func @transform_1(%arg0: i32) -> (i32, i32) {
    %c0_i32 = arith.constant 0 : i32
    %c0_i32_0 = arith.constant 0 : i32
    %c0_i32_1 = arith.constant 0 : i32
    return %c0_i32, %c0_i32_0 : i32, i32
  }
  func.func @transform_2(%arg0: i32) -> (i32, i32) {
    %c0_i32 = arith.constant 0 : i32
    %c0_i32_0 = arith.constant 0 : i32
    %c0_i32_1 = arith.constant 0 : i32
    return %c0_i32, %c0_i32_0 : i32, i32
  }
  func.func @transform_3(%arg0: i32) -> (i32, i32) {
    %c0_i32 = arith.constant 0 : i32
    %c0_i32_0 = arith.constant 0 : i32
    %c0_i32_1 = arith.constant 0 : i32
    return %c0_i32, %c0_i32_0 : i32, i32
  }
  func.func @transform_4(%arg0: i32) -> (i32, i32) {
    %c0_i32 = arith.constant 0 : i32
    %c0_i32_0 = arith.constant 0 : i32
    return %arg0, %c0_i32 : i32, i32
  }
}

module attributes {stable_mosaic.version = 11 : i64} {
  func.func @_gemm_res_relu_gap_kernel(%arg0: i32, %arg1: memref<64x384xbf16, #tpu.memory_space<vmem>>, %arg2: memref<384x128xbf16, #tpu.memory_space<vmem>>, %arg3: memref<1x128xf32, #tpu.memory_space<vmem>>, %arg4: memref<64x128xbf16, #tpu.memory_space<vmem>>, %arg5: memref<1x1x128xf32, #tpu.memory_space<vmem>>) attributes {dimension_semantics = [#tpu.dimension_semantics<parallel>], iteration_bounds = array<i64: 2>, scalar_prefetch = 0 : i64, scratch_operands = 0 : i64, tpu.core_type = #tpu.core_type<tc>, window_params = [{transform_indices = @transform_0, window_bounds = array<i64: 64, 384>}, {pipeline_mode = #tpu.pipeline_mode<synchronous>, transform_indices = @transform_1, window_bounds = array<i64: 384, 128>}, {pipeline_mode = #tpu.pipeline_mode<synchronous>, transform_indices = @transform_2, window_bounds = array<i64: 1, 128>}, {transform_indices = @transform_3, window_bounds = array<i64: 64, 128>}, {transform_indices = @transform_4, window_bounds = array<i64: 1, 1, 128>}]} {
    %c0 = arith.constant 0 : index
    %c0_0 = arith.constant 0 : index
    %0 = vector.load %arg1[%c0, %c0_0] : memref<64x384xbf16, #tpu.memory_space<vmem>>, vector<64x384xbf16>
    %c0_1 = arith.constant 0 : index
    %c0_2 = arith.constant 0 : index
    %1 = vector.load %arg2[%c0_1, %c0_2] : memref<384x128xbf16, #tpu.memory_space<vmem>>, vector<384x128xbf16>
    %cst = arith.constant dense<0.000000e+00> : vector<64x128xf32>
    %2 = tpu.matmul %0, %1, %cst {dimension_numbers = #tpu.dot_dimension_numbers<[1], [0], [0], [1], [0, 0, 1, 1], [], []>} : vector<64x384xbf16>, vector<384x128xbf16>, vector<64x128xf32> -> vector<64x128xf32>
    %c0_3 = arith.constant 0 : index
    %c0_4 = arith.constant 0 : index
    %3 = vector.load %arg3[%c0_3, %c0_4] : memref<1x128xf32, #tpu.memory_space<vmem>>, vector<1x128xf32>
    %4 = vector.broadcast %3 : vector<1x128xf32> to vector<64x128xf32>
    %5 = arith.addf %2, %4 : vector<64x128xf32>
    %c0_5 = arith.constant 0 : index
    %c0_6 = arith.constant 0 : index
    %6 = vector.load %arg4[%c0_5, %c0_6] : memref<64x128xbf16, #tpu.memory_space<vmem>>, vector<64x128xbf16>
    %7 = arith.extf %6 : vector<64x128xbf16> to vector<64x128xf32>
    %8 = arith.addf %5, %7 : vector<64x128xf32>
    %cst_7 = arith.constant 0.000000e+00 : f32
    %9 = vector.broadcast %cst_7 : f32 to vector<64x128xf32>
    %10 = arith.maximumf %8, %9 : vector<64x128xf32>
    %cst_8 = arith.constant dense<0.000000e+00> : vector<128xf32>
    %11 = vector.multi_reduction <add>, %10, %cst_8 [0] : vector<64x128xf32> to vector<128xf32>
    %12 = vector.shape_cast %11 : vector<128xf32> to vector<1x128xf32>
    %cst_9 = arith.constant 1.562500e-02 : f32
    %13 = vector.broadcast %cst_9 : f32 to vector<1x128xf32>
    %14 = arith.mulf %12, %13 : vector<1x128xf32>
    %15 = vector.shape_cast %14 : vector<1x128xf32> to vector<1x1x128xf32>
    %c0_10 = arith.constant 0 : index
    %c0_11 = arith.constant 0 : index
    %c0_12 = arith.constant 0 : index
    %16 = vector.load %arg5[%c0_10, %c0_11, %c0_12] : memref<1x1x128xf32, #tpu.memory_space<vmem>>, vector<1x1x128xf32>
    tpu.vector_store %arg5[%c0_10, %c0_11, %c0_12], %15 {strides = array<i32>} : memref<1x1x128xf32, #tpu.memory_space<vmem>>, vector<1x1x128xf32>,
    return
  }
  func.func @transform_0(%arg0: i32) -> (i32, i32) {
    %c0_i32 = arith.constant 0 : i32
    %c0_i32_0 = arith.constant 0 : i32
    return %arg0, %c0_i32 : i32, i32
  }
  func.func @transform_1(%arg0: i32) -> (i32, i32) {
    %c0_i32 = arith.constant 0 : i32
    %c0_i32_0 = arith.constant 0 : i32
    %c0_i32_1 = arith.constant 0 : i32
    return %c0_i32, %c0_i32_0 : i32, i32
  }
  func.func @transform_2(%arg0: i32) -> (i32, i32) {
    %c0_i32 = arith.constant 0 : i32
    %c0_i32_0 = arith.constant 0 : i32
    %c0_i32_1 = arith.constant 0 : i32
    return %c0_i32, %c0_i32_0 : i32, i32
  }
  func.func @transform_3(%arg0: i32) -> (i32, i32) {
    %c0_i32 = arith.constant 0 : i32
    %c0_i32_0 = arith.constant 0 : i32
    return %arg0, %c0_i32 : i32, i32
  }
  func.func @transform_4(%arg0: i32) -> (i32, i32, i32) {
    %c0_i32 = arith.constant 0 : i32
    %c0_i32_0 = arith.constant 0 : i32
    %c0_i32_1 = arith.constant 0 : i32
    return %arg0, %c0_i32, %c0_i32_0 : i32, i32, i32
  }
}

</mosaic_0001>

<bundles_post_ra>
// kernel: _lambda_.5
= control target key start
LH: loop header
LB: loop body
LE: loop exit
PB: predicated region body
PF: predicated region fallthrough
CT: control target
= control target key end

     0   :  { %s839_s12 = smov 0   ;;  %s973_s0 = inlined_call_operand.vmem [shape: bf16[512,128], index: 0, kind: input, shape index: {}]   ;;  %s974_s1 = inlined_call_operand.vmem [shape: bf16[128,128], index: 1, kind: input, shape index: {}]   ;;  %s975_s2 = inlined_call_operand.vmem [shape: f32[1,128], index: 2, kind: input, shape index: {}]   ;;  %s976_s3 = inlined_call_operand.vmem [shape: f32[512,128], index: 3, kind: output, shape index: {}]  }
   0x1 LB: > { %s655_s13 = sadd.s32 4294967295, %s817_s12   ;;  %p659_p0 = scmp.ge.s32.totalorder %s817_s12, 1  ;;  %s817_s12 = sphi %s839_s12, %s13_s12  }
   0x2   : > { %p138_p1 = scmp.lt.s32.totalorder %s817_s12, 3 }
   0x4   : > { %p139_p2 = pnand %p659_p0, %p138_p1 }
   0x5   : > { %v787_v0 = vld [vmem:[%s974_s1] sm:$0xff] (!%p139_p2)   ;;  %s660_s16 = sshll.u32 (!%p139_p2), %s655_s13, 5  ;;  %v788_v1 = vld [vmem:[%s974_s1 + $0x8] sm:$0xff] (!%p139_p2)   ;;  %v789_v2 = vld [vmem:[%s974_s1 + $0x10] sm:$0xff] (!%p139_p2)  }
   0x6   : > { %142 = sbr.rel (%p139_p2) target bundleno = 282 (0x11a), region = 32  ;;  %p163_p3 = scmp.lt.s32.totalorder (!%p139_p2), %s660_s16, 63  ;;  %715 = vmatprep.subr.bf16.mxu0 (!%p139_p2), %v787_v0  ;;  %763 = vmatprep.subr.bf16.mxu1 (!%p139_p2), %v787_v0  ;;  %v790_v3 = vld [vmem:[%s974_s1 + $0x18] sm:$0xff] (!%p139_p2)   ;;  %v791_v6 = vld [vmem:[%s974_s1 + $0x20] sm:$0xff] (!%p139_p2)   ;;  %v792_v7 = vld [vmem:[%s974_s1 + $0x28] sm:$0xff] (!%p139_p2)  }
   0x7   : > { %716 = vmatpush3.bf16.msra.mxu0 (!%p139_p2), %v787_v0  ;;  %771 = vmatpush3.bf16.msra.mxu1 (!%p139_p2), %v787_v0  ;;  %v793_v8 = vld [vmem:[%s974_s1 + $0x30] sm:$0xff] (!%p139_p2)   ;;  %v794_v9 = vld [vmem:[%s974_s1 + $0x38] sm:$0xff] (!%p139_p2)   ;;  %v898_v24 = vld [vmem:[%s975_s2] ss:$0 sm:$0xff] (!%p139_p2) }
   0x8   : > { %717 = vmatprep.subr.bf16.mxu0 (!%p139_p2), %v788_v1  ;;  %764 = vmatprep.subr.bf16.mxu1 (!%p139_p2), %v788_v1 }
   0xb   : > { %718 = vmatpush3.bf16.msra.mxu0 (!%p139_p2), %v788_v1  ;;  %772 = vmatpush3.bf16.msra.mxu1 (!%p139_p2), %v788_v1 }
   0xc   : > { %719 = vmatprep.subr.bf16.mxu0 (!%p139_p2), %v789_v2  ;;  %765 = vmatprep.subr.bf16.mxu1 (!%p139_p2), %v789_v2 }
   0xd   : > { %s978_s16 = smov (!%p163_p3, %s660_s16), 63 }
   0xe   : > { %s661_s21 = sshll.u32 %s978_s16, 2  ;;  %s663_s10 = sshll.u32 %s978_s16, 3 }
   0xf   : > { %s862_s24 = scalar_lea.vmem %s973_s0, %s661_s21  ;;  %720 = vmatpush3.bf16.msra.mxu0 %v789_v2  ;;  %773 = vmatpush3.bf16.msra.mxu1 %v789_v2  ;;  %s906_s14 = scalar_lea.vmem %s976_s3, %s663_s10 }
  0x10   : > { %v795_v4 = vld [vmem:[%s862_s24] sm:$0xff]   ;;  %721 = vmatprep.subr.bf16.mxu0 %v790_v3  ;;  %766 = vmatprep.subr.bf16.mxu1 %v790_v3  ;;  %v797_v10 = vld [vmem:[%s862_s24 + $0x8] sm:$0xff]   ;;  %v799_v12 = vld [vmem:[%s862_s24 + $0x10] sm:$0xff]  }
  0x11   : > { %v796_v5 = vld [vmem:[%s862_s24 + $0x40] sm:$0xff]   ;;  %731 = vmatprep.mubr.bf16.mxu0 %v795_v4  ;;  %v798_v11 = vld [vmem:[%s862_s24 + $0x48] sm:$0xff]   ;;  %v800_v13 = vld [vmem:[%s862_s24 + $0x50] sm:$0xff]  }
  0x12   : > { %747 = vmatprep.mubr.bf16.mxu1 %v796_v5  ;;  %v801_v14 = vld [vmem:[%s862_s24 + $0x18] sm:$0xff]   ;;  %v803_v16 = vld [vmem:[%s862_s24 + $0x20] sm:$0xff]   ;;  %v805_v18 = vld [vmem:[%s862_s24 + $0x28] sm:$0xff]  }
  0x13   : > { %722 = vmatpush3.bf16.msra.mxu0 %v790_v3  ;;  %774 = vmatpush3.bf16.msra.mxu1 %v790_v3  ;;  %v802_v15 = vld [vmem:[%s862_s24 + $0x58] sm:$0xff]   ;;  %v804_v17 = vld [vmem:[%s862_s24 + $0x60] sm:$0xff]   ;;  %v806_v19 = vld [vmem:[%s862_s24 + $0x68] sm:$0xff]  }
  0x14   : > { %723 = vmatprep.subr.bf16.mxu0 %v791_v6  ;;  %767 = vmatprep.subr.bf16.mxu1 %v791_v6  ;;  %v807_v20 = vld [vmem:[%s862_s24 + $0x30] sm:$0xff]   ;;  %v809_v22 = vld [vmem:[%s862_s24 + $0x38] sm:$0xff]  }
  0x15   : > { %v808_v21 = vld [vmem:[%s862_s24 + $0x70] sm:$0xff]   ;;  %v810_v23 = vld [vmem:[%s862_s24 + $0x78] sm:$0xff]  }
  0x17   : > { %724 = vmatpush3.bf16.msra.mxu0 %v791_v6  ;;  %775 = vmatpush3.bf16.msra.mxu1 %v791_v6 }
  0x18   : > { %725 = vmatprep.subr.bf16.mxu0 %v792_v7  ;;  %768 = vmatprep.subr.bf16.mxu1 %v792_v7 }
  0x1b   : > { %726 = vmatpush3.bf16.msra.mxu0 %v792_v7  ;;  %776 = vmatpush3.bf16.msra.mxu1 %v792_v7 }
  0x1c   : > { %727 = vmatprep.subr.bf16.mxu0 %v793_v8  ;;  %769 = vmatprep.subr.bf16.mxu1 %v793_v8 }
  0x1f   : > { %728 = vmatpush3.bf16.msra.mxu0 %v793_v8  ;;  %777 = vmatpush3.bf16.msra.mxu1 %v793_v8 }
  0x20   : > { %729 = vmatprep.subr.bf16.mxu0 %v794_v9  ;;  %770 = vmatprep.subr.bf16.mxu1 %v794_v9 }
  0x23   : > { %730 = vmatpush3.bf16.msra.mxu0 %v794_v9  ;;  %778 = vmatpush3.bf16.msra.mxu1 %v794_v9 }
  0x26   : > { %732 = vmatmul.mubr.bf16.vlgmr.msra.gmra.mrb[0].mxu0 %v797_v10  ;;  %748 = vmatmul.mubr.bf16.vlgmr.msra.gmra.mrb[0].mxu1 %v798_v11 }
  0x27   : > { %735 = vmatprep.mubr.bf16.mxu0 %v799_v12  ;;  %751 = vmatprep.mubr.bf16.mxu1 %v800_v13 }
  0x2e   : > { %736 = vmatmul.mubr.bf16.gmra.mrb[4].mxu0 %v801_v14  ;;  %752 = vmatmul.mubr.bf16.gmra.mrb[4].mxu1 %v802_v15 }
  0x2f   : > { %739 = vmatprep.mubr.bf16.mxu0 %v803_v16  ;;  %755 = vmatprep.mubr.bf16.mxu1 %v804_v17 }
  0x36   : > { %740 = vmatmul.mubr.bf16.gmra.mrb[8].mxu0 %v805_v18  ;;  %756 = vmatmul.mubr.bf16.gmra.mrb[8].mxu1 %v806_v19 }
  0x37   : > { %743 = vmatprep.mubr.bf16.mxu0 %v807_v20  ;;  %759 = vmatprep.mubr.bf16.mxu1 %v808_v21 }
  0x3e   : > { %744 = vmatmul.mubr.bf16.gmra.mrb[12].mxu0 %v809_v22  ;;  %760 = vmatmul.mubr.bf16.gmra.mrb[12].mxu1 %v810_v23 }
  0xf9   : > { %v733_v25 = vpop.f32.mrb[0].mxu0  ;;  %v749_v26 = vpop.f32.mrb[0].mxu1 }
  0xfa   : > { %v417_v27 = vadd.f32 %v733_v25, %v898_v24  ;;  %v481_v28 = vadd.f32 %v749_v26, %v898_v24  ;;  %v408_v29 = vpop.f32.mrb[1].mxu0  ;;  %v472_v30 = vpop.f32.mrb[1].mxu1 }
  0xfb   : > { %v409_v31 = vadd.f32 %v898_v24, %v408_v29  ;;  %v473_v32 = vadd.f32 %v898_v24, %v472_v30  ;;  %v734_v33 = vpop.f32.mrb[2].mxu0  ;;  %v750_v34 = vpop.f32.mrb[2].mxu1 }
  0xfc   : > { %v537_v35 = vmax.f32 %v417_v27, 0.0  ;;  %v553_v36 = vmax.f32 %v481_v28, 0.0  ;;  %v420_v37 = vadd.f32 %v734_v33, %v898_v24  ;;  %v484_v38 = vadd.f32 %v750_v34, %v898_v24  ;;  %v411_v39 = vpop.f32.mrb[3].mxu0  ;;  %v475_v40 = vpop.f32.mrb[3].mxu1 }
  0xfd   : > { %v535_v41 = vmax.f32 %v409_v31, 0.0  ;;  %v551_v42 = vmax.f32 %v473_v32, 0.0  ;;  %v412_v43 = vadd.f32 %v898_v24, %v411_v39  ;;  %v476_v44 = vadd.f32 %v898_v24, %v475_v40 }
  0xfe   : > { %569 = vst [vmem:[%s906_s14 + $0x10] sm:$0xff] %v537_v35  ;;  %585 = vst [vmem:[%s906_s14 + $0x90] sm:$0xff] %v553_v36  ;;  %v538_v45 = vmax.f32 %v420_v37, 0.0  ;;  %v554_v46 = vmax.f32 %v484_v38, 0.0 }
  0xff   : > { %567 = vst [vmem:[%s906_s14] sm:$0xff] %v535_v41  ;;  %583 = vst [vmem:[%s906_s14 + $0x80] sm:$0xff] %v551_v42  ;;  %v536_v47 = vmax.f32 %v412_v43, 0.0  ;;  %v552_v48 = vmax.f32 %v476_v44, 0.0 }
 0x100   : > { %570 = vst [vmem:[%s906_s14 + $0x18] sm:$0xff] %v538_v45  ;;  %586 = vst [vmem:[%s906_s14 + $0x98] sm:$0xff] %v554_v46 }
 0x101   : > { %568 = vst [vmem:[%s906_s14 + $0x8] sm:$0xff] %v536_v47  ;;  %584 = vst [vmem:[%s906_s14 + $0x88] sm:$0xff] %v552_v48  ;;  %v737_v49 = vpop.f32.mrb[4].mxu0  ;;  %v753_v50 = vpop.f32.mrb[4].mxu1 }
 0x102   : > { %v433_v51 = vadd.f32 %v737_v49, %v898_v24  ;;  %v497_v52 = vadd.f32 %v753_v50, %v898_v24  ;;  %v424_v53 = vpop.f32.mrb[5].mxu0  ;;  %v488_v54 = vpop.f32.mrb[5].mxu1 }
 0x103   : > { %v425_v55 = vadd.f32 %v898_v24, %v424_v53  ;;  %v489_v56 = vadd.f32 %v898_v24, %v488_v54  ;;  %v738_v57 = vpop.f32.mrb[6].mxu0  ;;  %v754_v58 = vpop.f32.mrb[6].mxu1 }
 0x104   : > { %v541_v59 = vmax.f32 %v433_v51, 0.0  ;;  %v557_v60 = vmax.f32 %v497_v52, 0.0  ;;  %v436_v61 = vadd.f32 %v738_v57, %v898_v24  ;;  %v500_v62 = vadd.f32 %v754_v58, %v898_v24  ;;  %v427_v63 = vpop.f32.mrb[7].mxu0  ;;  %v491_v0 = vpop.f32.mrb[7].mxu1 }
 0x105   : > { %v539_v1 = vmax.f32 %v425_v55, 0.0  ;;  %v555_v2 = vmax.f32 %v489_v56, 0.0  ;;  %v428_v3 = vadd.f32 %v898_v24, %v427_v63  ;;  %v492_v4 = vadd.f32 %v898_v24, %v491_v0 }
 0x106   : > { %573 = vst [vmem:[%s906_s14 + $0x30] sm:$0xff] %v541_v59  ;;  %589 = vst [vmem:[%s906_s14 + $0xb0] sm:$0xff] %v557_v60  ;;  %v542_v5 = vmax.f32 %v436_v61, 0.0  ;;  %v558_v6 = vmax.f32 %v500_v62, 0.0 }
 0x107   : > { %571 = vst [vmem:[%s906_s14 + $0x20] sm:$0xff] %v539_v1  ;;  %587 = vst [vmem:[%s906_s14 + $0xa0] sm:$0xff] %v555_v2  ;;  %v540_v7 = vmax.f32 %v428_v3, 0.0  ;;  %v556_v8 = vmax.f32 %v492_v4, 0.0 }
 0x108   : > { %574 = vst [vmem:[%s906_s14 + $0x38] sm:$0xff] %v542_v5  ;;  %590 = vst [vmem:[%s906_s14 + $0xb8] sm:$0xff] %v558_v6 }
 0x109   : > { %572 = vst [vmem:[%s906_s14 + $0x28] sm:$0xff] %v540_v7  ;;  %588 = vst [vmem:[%s906_s14 + $0xa8] sm:$0xff] %v556_v8  ;;  %v741_v9 = vpop.f32.mrb[8].mxu0  ;;  %v757_v10 = vpop.f32.mrb[8].mxu1 }
 0x10a   : > { %v449_v11 = vadd.f32 %v741_v9, %v898_v24  ;;  %v513_v12 = vadd.f32 %v757_v10, %v898_v24  ;;  %v440_v13 = vpop.f32.mrb[9].mxu0  ;;  %v504_v14 = vpop.f32.mrb[9].mxu1 }
 0x10b   : > { %v441_v15 = vadd.f32 %v898_v24, %v440_v13  ;;  %v505_v16 = vadd.f32 %v898_v24, %v504_v14  ;;  %v742_v17 = vpop.f32.mrb[10].mxu0  ;;  %v758_v18 = vpop.f32.mrb[10].mxu1 }
 0x10c   : > { %v545_v19 = vmax.f32 %v449_v11, 0.0  ;;  %v561_v20 = vmax.f32 %v513_v12, 0.0  ;;  %v452_v21 = vadd.f32 %v742_v17, %v898_v24  ;;  %v516_v22 = vadd.f32 %v758_v18, %v898_v24  ;;  %v443_v23 = vpop.f32.mrb[11].mxu0  ;;  %v507_v25 = vpop.f32.mrb[11].mxu1 }
 0x10d   : > { %v543_v26 = vmax.f32 %v441_v15, 0.0  ;;  %v559_v27 = vmax.f32 %v505_v16, 0.0  ;;  %v444_v28 = vadd.f32 %v898_v24, %v443_v23  ;;  %v508_v29 = vadd.f32 %v898_v24, %v507_v25 }
 0x10e   : > { %577 = vst [vmem:[%s906_s14 + $0x50] sm:$0xff] %v545_v19  ;;  %593 = vst [vmem:[%s906_s14 + $0xd0] sm:$0xff] %v561_v20  ;;  %v546_v30 = vmax.f32 %v452_v21, 0.0  ;;  %v562_v31 = vmax.f32 %v516_v22, 0.0 }
 0x10f   : > { %575 = vst [vmem:[%s906_s14 + $0x40] sm:$0xff] %v543_v26  ;;  %591 = vst [vmem:[%s906_s14 + $0xc0] sm:$0xff] %v559_v27  ;;  %v544_v32 = vmax.f32 %v444_v28, 0.0  ;;  %v560_v33 = vmax.f32 %v508_v29, 0.0 }
 0x110   : > { %578 = vst [vmem:[%s906_s14 + $0x58] sm:$0xff] %v546_v30  ;;  %594 = vst [vmem:[%s906_s14 + $0xd8] sm:$0xff] %v562_v31 }
 0x111   : > { %576 = vst [vmem:[%s906_s14 + $0x48] sm:$0xff] %v544_v32  ;;  %592 = vst [vmem:[%s906_s14 + $0xc8] sm:$0xff] %v560_v33  ;;  %v745_v34 = vpop.f32.mrb[12].mxu0  ;;  %v761_v35 = vpop.f32.mrb[12].mxu1 }
 0x112   : > { %v465_v36 = vadd.f32 %v745_v34, %v898_v24  ;;  %v529_v37 = vadd.f32 %v761_v35, %v898_v24  ;;  %v456_v38 = vpop.f32.mrb[13].mxu0  ;;  %v520_v39 = vpop.f32.mrb[13].mxu1 }
 0x113   : > { %v457_v40 = vadd.f32 %v898_v24, %v456_v38  ;;  %v521_v41 = vadd.f32 %v898_v24, %v520_v39  ;;  %v746_v42 = vpop.f32.mrb[14].mxu0  ;;  %v762_v43 = vpop.f32.mrb[14].mxu1 }
 0x114   : > { %v549_v44 = vmax.f32 %v465_v36, 0.0  ;;  %v565_v45 = vmax.f32 %v529_v37, 0.0  ;;  %v468_v46 = vadd.f32 %v746_v42, %v898_v24  ;;  %v532_v47 = vadd.f32 %v762_v43, %v898_v24  ;;  %v459_v48 = vpop.f32.mrb[15].mxu0  ;;  %v523_v49 = vpop.f32.mrb[15].mxu1 }
 0x115   : > { %v547_v50 = vmax.f32 %v457_v40, 0.0  ;;  %v563_v51 = vmax.f32 %v521_v41, 0.0  ;;  %v460_v52 = vadd.f32 %v898_v24, %v459_v48  ;;  %v524_v53 = vadd.f32 %v898_v24, %v523_v49 }
 0x116   : > { %581 = vst [vmem:[%s906_s14 + $0x70] sm:$0xff] %v549_v44  ;;  %597 = vst [vmem:[%s906_s14 + $0xf0] sm:$0xff] %v565_v45  ;;  %v550_v54 = vmax.f32 %v468_v46, 0.0  ;;  %v566_v55 = vmax.f32 %v532_v47, 0.0 }
 0x117   : > { %579 = vst [vmem:[%s906_s14 + $0x60] sm:$0xff] %v547_v50  ;;  %595 = vst [vmem:[%s906_s14 + $0xe0] sm:$0xff] %v563_v51  ;;  %v548_v56 = vmax.f32 %v460_v52, 0.0  ;;  %v564_v57 = vmax.f32 %v524_v53, 0.0 }
 0x118   : > { %582 = vst [vmem:[%s906_s14 + $0x78] sm:$0xff] %v550_v54  ;;  %598 = vst [vmem:[%s906_s14 + $0xf8] sm:$0xff] %v566_v55 }
 0x119   : > { %580 = vst [vmem:[%s906_s14 + $0x68] sm:$0xff] %v548_v56  ;;  %596 = vst [vmem:[%s906_s14 + $0xe8] sm:$0xff] %v564_v57 }
 0x11a PF: > { %s13_s12 = sadd.s32 1, %s817_s12  }
 0x11b   : > { %p10_p4 = scmp.ge.s32.totalorder %s13_s12, 4  }
 0x11d   :  { %12 = sbr.rel (!%p10_p4) target bundleno = 1 (0x1), region = 62 }

// kernel: _lambda_.6
= control target key start
LH: loop header
LB: loop body
LE: loop exit
PB: predicated region body
PF: predicated region fallthrough
CT: control target
= control target key end

     0   :  { %s1076_s12 = smov 0   ;;  %s1253_s0 = inlined_call_operand.vmem [shape: bf16[512,256], index: 0, kind: input, shape index: {}]   ;;  %s1254_s1 = inlined_call_operand.vmem [shape: bf16[256,128], index: 1, kind: input, shape index: {}]   ;;  %s1255_s2 = inlined_call_operand.vmem [shape: f32[1,128], index: 2, kind: input, shape index: {}]   ;;  %s1256_s3 = inlined_call_operand.vmem [shape: f32[512,128], index: 3, kind: output, shape index: {}]  }
   0x1 LB: > { %s786_s13 = sadd.s32 4294967295, %s1054_s12   ;;  %p790_p0 = scmp.ge.s32.totalorder %s1054_s12, 1  ;;  %s1054_s12 = sphi %s1076_s12, %s13_s12  }
   0x2   : > { %p139_p1 = scmp.lt.s32.totalorder %s1054_s12, 3 }
   0x4   : > { %p140_p2 = pnand %p790_p0, %p139_p1 }
   0x5   : > { %v984_v0 = vld [vmem:[%s1254_s1 + $0x40] sm:$0xff] (!%p140_p2)   ;;  %s791_s16 = sshll.u32 (!%p140_p2), %s786_s13, 5  ;;  %v986_v2 = vld [vmem:[%s1254_s1 + $0x48] sm:$0xff] (!%p140_p2)   ;;  %v988_v4 = vld [vmem:[%s1254_s1 + $0x50] sm:$0xff] (!%p140_p2)  }
   0x6   : > { %143 = sbr.rel (%p140_p2) target bundleno = 316 (0x13c), region = 32  ;;  %v985_v1 = vld [vmem:[%s1254_s1] sm:$0xff] (!%p140_p2)   ;;  %848 = vmatprep.subr.bf16.mxu0 (!%p140_p2), %v984_v0  ;;  %960 = vmatprep.subr.bf16.mxu1 (!%p140_p2), %v984_v0  ;;  %v987_v3 = vld [vmem:[%s1254_s1 + $0x8] sm:$0xff] (!%p140_p2)   ;;  %p165_p3 = scmp.lt.s32.totalorder (!%p140_p2), %s791_s16, 63  ;;  %v989_v5 = vld [vmem:[%s1254_s1 + $0x10] sm:$0xff] (!%p140_p2)  }
   0x7   : > { %849 = vmatpush3.bf16.msra.mxu0 (!%p140_p2), %v985_v1  ;;  %968 = vmatpush3.bf16.msra.mxu1 (!%p140_p2), %v985_v1  ;;  %v990_v6 = vld [vmem:[%s1254_s1 + $0x58] sm:$0xff] (!%p140_p2)   ;;  %v992_v8 = vld [vmem:[%s1254_s1 + $0x60] sm:$0xff] (!%p140_p2)   ;;  %v994_v10 = vld [vmem:[%s1254_s1 + $0x68] sm:$0xff] (!%p140_p2)  }
   0x8   : > { %850 = vmatprep.subr.bf16.mxu0 (!%p140_p2), %v986_v2  ;;  %961 = vmatprep.subr.bf16.mxu1 (!%p140_p2), %v986_v2  ;;  %v991_v7 = vld [vmem:[%s1254_s1 + $0x18] sm:$0xff] (!%p140_p2)   ;;  %v993_v9 = vld [vmem:[%s1254_s1 + $0x20] sm:$0xff] (!%p140_p2)   ;;  %v995_v13 = vld [vmem:[%s1254_s1 + $0x28] sm:$0xff] (!%p140_p2)  }
   0x9   : > { %v996_v14 = vld [vmem:[%s1254_s1 + $0x70] sm:$0xff] (!%p140_p2)   ;;  %v998_v16 = vld [vmem:[%s1254_s1 + $0x78] sm:$0xff] (!%p140_p2)   ;;  %v1177_v50 = vld [vmem:[%s1255_s2] ss:$0 sm:$0xff] (!%p140_p2) }
   0xa   : > { %v997_v15 = vld [vmem:[%s1254_s1 + $0x30] sm:$0xff] (!%p140_p2)   ;;  %v999_v17 = vld [vmem:[%s1254_s1 + $0x38] sm:$0xff] (!%p140_p2)  }
   0xb   : > { %851 = vmatpush3.bf16.msra.mxu0 (!%p140_p2), %v987_v3  ;;  %969 = vmatpush3.bf16.msra.mxu1 (!%p140_p2), %v987_v3 }
   0xc   : > { %852 = vmatprep.subr.bf16.mxu0 (!%p140_p2), %v988_v4  ;;  %962 = vmatprep.subr.bf16.mxu1 (!%p140_p2), %v988_v4 }
   0xd   : > { %s1258_s16 = smov (!%p165_p3, %s791_s16), 63 }
   0xe   : > { %s847_s4 = sshll.u32 %s1258_s16, 3 }
   0xf   : > { %853 = vmatpush3.bf16.msra.mxu0 %v989_v5  ;;  %970 = vmatpush3.bf16.msra.mxu1 %v989_v5  ;;  %s1119_s9 = scalar_lea.vmem %s1253_s0, %s847_s4  ;;  %s1186_s30 = scalar_lea.vmem %s1256_s3, %s847_s4 }
  0x10   : > { %854 = vmatprep.subr.bf16.mxu0 %v990_v6  ;;  %963 = vmatprep.subr.bf16.mxu1 %v990_v6  ;;  %v1002_v11 = vld [vmem:[%s1119_s9 + $0x4] ss:$8 sps:$4 sm:$0xff]   ;;  %v1000_v18 = vld [vmem:[%s1119_s9] ss:$8 sps:$4 sm:$0xff]   ;;  %v1006_v20 = vld [vmem:[%s1119_s9 + $0x14] ss:$8 sps:$4 sm:$0xff]  }
  0x11   : > { %v1005_v12 = vld [vmem:[%s1119_s9 + $0x84] ss:$8 sps:$4 sm:$0xff]   ;;  %537 = vmatprep.mubr.bf16.mxu0 %v1002_v11  ;;  %v1003_v19 = vld [vmem:[%s1119_s9 + $0x80] ss:$8 sps:$4 sm:$0xff]   ;;  %v1008_v21 = vld [vmem:[%s1119_s9 + $0x94] ss:$8 sps:$4 sm:$0xff]  }
  0x12   : > { %601 = vmatprep.mubr.bf16.mxu1 %v1005_v12  ;;  %v1010_v22 = vld [vmem:[%s1119_s9 + $0x10] ss:$8 sps:$4 sm:$0xff]   ;;  %v1012_v24 = vld [vmem:[%s1119_s9 + $0x24] ss:$8 sps:$4 sm:$0xff]   ;;  %v1016_v26 = vld [vmem:[%s1119_s9 + $0x20] ss:$8 sps:$4 sm:$0xff]  }
  0x13   : > { %855 = vmatpush3.bf16.msra.mxu0 %v991_v7  ;;  %971 = vmatpush3.bf16.msra.mxu1 %v991_v7  ;;  %v1011_v23 = vld [vmem:[%s1119_s9 + $0x90] ss:$8 sps:$4 sm:$0xff]   ;;  %v1014_v25 = vld [vmem:[%s1119_s9 + $0xa4] ss:$8 sps:$4 sm:$0xff]   ;;  %v1017_v27 = vld [vmem:[%s1119_s9 + $0xa0] ss:$8 sps:$4 sm:$0xff]  }
  0x14   : > { %856 = vmatprep.subr.bf16.mxu0 %v992_v8  ;;  %964 = vmatprep.subr.bf16.mxu1 %v992_v8  ;;  %v1018_v28 = vld [vmem:[%s1119_s9 + $0x34] ss:$8 sps:$4 sm:$0xff]   ;;  %v1022_v30 = vld [vmem:[%s1119_s9 + $0x30] ss:$8 sps:$4 sm:$0xff]   ;;  %v1024_v32 = vld [vmem:[%s1119_s9 + $0x44] ss:$8 sps:$4 sm:$0xff]  }
  0x15   : > { %v1020_v29 = vld [vmem:[%s1119_s9 + $0xb4] ss:$8 sps:$4 sm:$0xff]   ;;  %v1023_v31 = vld [vmem:[%s1119_s9 + $0xb0] ss:$8 sps:$4 sm:$0xff]   ;;  %v1026_v33 = vld [vmem:[%s1119_s9 + $0xc4] ss:$8 sps:$4 sm:$0xff]  }
  0x16   : > { %v1028_v34 = vld [vmem:[%s1119_s9 + $0x40] ss:$8 sps:$4 sm:$0xff]   ;;  %v1030_v36 = vld [vmem:[%s1119_s9 + $0x54] ss:$8 sps:$4 sm:$0xff]   ;;  %v1034_v38 = vld [vmem:[%s1119_s9 + $0x50] ss:$8 sps:$4 sm:$0xff]  }
  0x17   : > { %857 = vmatpush3.bf16.msra.mxu0 %v993_v9  ;;  %972 = vmatpush3.bf16.msra.mxu1 %v993_v9  ;;  %v1029_v35 = vld [vmem:[%s1119_s9 + $0xc0] ss:$8 sps:$4 sm:$0xff]   ;;  %v1032_v37 = vld [vmem:[%s1119_s9 + $0xd4] ss:$8 sps:$4 sm:$0xff]   ;;  %v1035_v39 = vld [vmem:[%s1119_s9 + $0xd0] ss:$8 sps:$4 sm:$0xff]  }
  0x18   : > { %858 = vmatprep.subr.bf16.mxu0 %v994_v10  ;;  %965 = vmatprep.subr.bf16.mxu1 %v994_v10  ;;  %v1036_v40 = vld [vmem:[%s1119_s9 + $0x64] ss:$8 sps:$4 sm:$0xff]   ;;  %v1040_v42 = vld [vmem:[%s1119_s9 + $0x60] ss:$8 sps:$4 sm:$0xff]   ;;  %v1042_v44 = vld [vmem:[%s1119_s9 + $0x74] ss:$8 sps:$4 sm:$0xff]  }
  0x19   : > { %v1038_v41 = vld [vmem:[%s1119_s9 + $0xe4] ss:$8 sps:$4 sm:$0xff]   ;;  %v1041_v43 = vld [vmem:[%s1119_s9 + $0xe0] ss:$8 sps:$4 sm:$0xff]   ;;  %v1044_v45 = vld [vmem:[%s1119_s9 + $0xf4] ss:$8 sps:$4 sm:$0xff]  }
  0x1a   : > { %v1046_v46 = vld [vmem:[%s1119_s9 + $0x70] ss:$8 sps:$4 sm:$0xff]  }
  0x1b   : > { %859 = vmatpush3.bf16.msra.mxu0 %v995_v13  ;;  %973 = vmatpush3.bf16.msra.mxu1 %v995_v13  ;;  %v1047_v47 = vld [vmem:[%s1119_s9 + $0xf0] ss:$8 sps:$4 sm:$0xff]  }
  0x1c   : > { %860 = vmatprep.subr.bf16.mxu0 %v996_v14  ;;  %966 = vmatprep.subr.bf16.mxu1 %v996_v14 }
  0x1f   : > { %861 = vmatpush3.bf16.msra.mxu0 %v997_v15  ;;  %974 = vmatpush3.bf16.msra.mxu1 %v997_v15 }
  0x20   : > { %862 = vmatprep.subr.bf16.mxu0 %v998_v16  ;;  %967 = vmatprep.subr.bf16.mxu1 %v998_v16 }
  0x23   : > { %863 = vmatpush3.bf16.msra.mxu0 %v999_v17  ;;  %975 = vmatpush3.bf16.msra.mxu1 %v999_v17 }
  0x26   : > { %538 = vmatmul.mubr.bf16.vlgmr.msra.gmra.mrb[0].mxu0 %v1000_v18  ;;  %602 = vmatmul.mubr.bf16.vlgmr.msra.gmra.mrb[0].mxu1 %v1003_v19 }
  0x27   : > { %545 = vmatprep.mubr.bf16.mxu0 %v1006_v20  ;;  %609 = vmatprep.mubr.bf16.mxu1 %v1008_v21 }
  0x2e   : > { %546 = vmatmul.mubr.bf16.gmra.mrb[4].mxu0 %v1010_v22  ;;  %610 = vmatmul.mubr.bf16.gmra.mrb[4].mxu1 %v1011_v23 }
  0x2f   : > { %553 = vmatprep.mubr.bf16.mxu0 %v1012_v24  ;;  %617 = vmatprep.mubr.bf16.mxu1 %v1014_v25 }
  0x36   : > { %554 = vmatmul.mubr.bf16.gmra.mrb[8].mxu0 %v1016_v26  ;;  %618 = vmatmul.mubr.bf16.gmra.mrb[8].mxu1 %v1017_v27 }
  0x37   : > { %561 = vmatprep.mubr.bf16.mxu0 %v1018_v28  ;;  %625 = vmatprep.mubr.bf16.mxu1 %v1020_v29 }
  0x3e   : > { %562 = vmatmul.mubr.bf16.gmra.mrb[12].mxu0 %v1022_v30  ;;  %626 = vmatmul.mubr.bf16.gmra.mrb[12].mxu1 %v1023_v31 }
  0x3f   : > { %569 = vmatprep.mubr.bf16.mxu0 %v1024_v32  ;;  %633 = vmatprep.mubr.bf16.mxu1 %v1026_v33 }
  0x46   : > { %570 = vmatmul.mubr.bf16.gmra.mrb[16].mxu0 %v1028_v34  ;;  %634 = vmatmul.mubr.bf16.gmra.mrb[16].mxu1 %v1029_v35 }
  0x47   : > { %577 = vmatprep.mubr.bf16.mxu0 %v1030_v36  ;;  %641 = vmatprep.mubr.bf16.mxu1 %v1032_v37 }
  0x4e   : > { %578 = vmatmul.mubr.bf16.gmra.mrb[20].mxu0 %v1034_v38  ;;  %642 = vmatmul.mubr.bf16.gmra.mrb[20].mxu1 %v1035_v39 }
  0x4f   : > { %585 = vmatprep.mubr.bf16.mxu0 %v1036_v40  ;;  %649 = vmatprep.mubr.bf16.mxu1 %v1038_v41 }
  0x56   : > { %586 = vmatmul.mubr.bf16.gmra.mrb[24].mxu0 %v1040_v42  ;;  %650 = vmatmul.mubr.bf16.gmra.mrb[24].mxu1 %v1041_v43 }
  0x57   : > { %593 = vmatprep.mubr.bf16.mxu0 %v1042_v44  ;;  %657 = vmatprep.mubr.bf16.mxu1 %v1044_v45 }
  0x5e   : > { %594 = vmatmul.mubr.bf16.gmra.mrb[28].mxu0 %v1046_v46  ;;  %658 = vmatmul.mubr.bf16.gmra.mrb[28].mxu1 %v1047_v47 }
  0xf9   : > { %v864_v48 = vpop.f32.mrb[0].mxu0  ;;  %v912_v49 = vpop.f32.mrb[0].mxu1 }
  0xfa   : > { %v865_v51 = vpop.f32.mrb[1].mxu0  ;;  %v913_v52 = vpop.f32.mrb[1].mxu1 }
  0xfb   : > { %v866_v53 = vadd.f32 %v865_v51, %v864_v48  ;;  %v914_v54 = vadd.f32 %v913_v52, %v912_v49  ;;  %v867_v55 = vpop.f32.mrb[2].mxu0  ;;  %v915_v56 = vpop.f32.mrb[2].mxu1 }
  0xfc   : > { %v868_v57 = vpop.f32.mrb[3].mxu0  ;;  %v916_v58 = vpop.f32.mrb[3].mxu1 }
  0xfd   : > { %v540_v59 = vadd.f32 %v866_v53, %v1177_v50  ;;  %v604_v60 = vadd.f32 %v914_v54, %v1177_v50  ;;  %v869_v61 = vadd.f32 %v868_v57, %v867_v55  ;;  %v917_v62 = vadd.f32 %v916_v58, %v915_v56 }
  0xff   : > { %v666_v63 = vmax.f32 %v540_v59, 0.0  ;;  %v682_v0 = vmax.f32 %v604_v60, 0.0  ;;  %v543_v1 = vadd.f32 %v869_v61, %v1177_v50  ;;  %v607_v2 = vadd.f32 %v917_v62, %v1177_v50 }
 0x101   : > { %698 = vst [vmem:[%s1186_s30] sm:$0xff] %v666_v63  ;;  %714 = vst [vmem:[%s1186_s30 + $0x80] sm:$0xff] %v682_v0  ;;  %v667_v3 = vmax.f32 %v543_v1, 0.0  ;;  %v683_v4 = vmax.f32 %v607_v2, 0.0  ;;  %v870_v5 = vpop.f32.mrb[4].mxu0  ;;  %v918_v6 = vpop.f32.mrb[4].mxu1 }
 0x102   : > { %v871_v7 = vpop.f32.mrb[5].mxu0  ;;  %v919_v8 = vpop.f32.mrb[5].mxu1 }
 0x103   : > { %699 = vst [vmem:[%s1186_s30 + $0x8] sm:$0xff] %v667_v3  ;;  %715 = vst [vmem:[%s1186_s30 + $0x88] sm:$0xff] %v683_v4  ;;  %v872_v9 = vadd.f32 %v871_v7, %v870_v5  ;;  %v920_v10 = vadd.f32 %v919_v8, %v918_v6  ;;  %v873_v11 = vpop.f32.mrb[6].mxu0  ;;  %v921_v12 = vpop.f32.mrb[6].mxu1 }
 0x104   : > { %v874_v13 = vpop.f32.mrb[7].mxu0  ;;  %v922_v14 = vpop.f32.mrb[7].mxu1 }
 0x105   : > { %v548_v15 = vadd.f32 %v872_v9, %v1177_v50  ;;  %v612_v16 = vadd.f32 %v920_v10, %v1177_v50  ;;  %v875_v17 = vadd.f32 %v874_v13, %v873_v11  ;;  %v923_v18 = vadd.f32 %v922_v14, %v921_v12 }
 0x107   : > { %v668_v19 = vmax.f32 %v548_v15, 0.0  ;;  %v684_v20 = vmax.f32 %v612_v16, 0.0  ;;  %v551_v21 = vadd.f32 %v875_v17, %v1177_v50  ;;  %v615_v22 = vadd.f32 %v923_v18, %v1177_v50 }
 0x109   : > { %700 = vst [vmem:[%s1186_s30 + $0x10] sm:$0xff] %v668_v19  ;;  %716 = vst [vmem:[%s1186_s30 + $0x90] sm:$0xff] %v684_v20  ;;  %v669_v23 = vmax.f32 %v551_v21, 0.0  ;;  %v685_v24 = vmax.f32 %v615_v22, 0.0  ;;  %v876_v25 = vpop.f32.mrb[8].mxu0  ;;  %v924_v26 = vpop.f32.mrb[8].mxu1 }
 0x10a   : > { %v877_v27 = vpop.f32.mrb[9].mxu0  ;;  %v925_v28 = vpop.f32.mrb[9].mxu1 }
 0x10b   : > { %701 = vst [vmem:[%s1186_s30 + $0x18] sm:$0xff] %v669_v23  ;;  %717 = vst [vmem:[%s1186_s30 + $0x98] sm:$0xff] %v685_v24  ;;  %v878_v29 = vadd.f32 %v877_v27, %v876_v25  ;;  %v926_v30 = vadd.f32 %v925_v28, %v924_v26  ;;  %v879_v31 = vpop.f32.mrb[10].mxu0  ;;  %v927_v32 = vpop.f32.mrb[10].mxu1 }
 0x10c   : > { %v880_v33 = vpop.f32.mrb[11].mxu0  ;;  %v928_v34 = vpop.f32.mrb[11].mxu1 }
 0x10d   : > { %v556_v35 = vadd.f32 %v878_v29, %v1177_v50  ;;  %v620_v36 = vadd.f32 %v926_v30, %v1177_v50  ;;  %v881_v37 = vadd.f32 %v880_v33, %v879_v31  ;;  %v929_v38 = vadd.f32 %v928_v34, %v927_v32 }
 0x10f   : > { %v670_v39 = vmax.f32 %v556_v35, 0.0  ;;  %v686_v40 = vmax.f32 %v620_v36, 0.0  ;;  %v559_v41 = vadd.f32 %v881_v37, %v1177_v50  ;;  %v623_v42 = vadd.f32 %v929_v38, %v1177_v50 }
 0x111   : > { %702 = vst [vmem:[%s1186_s30 + $0x20] sm:$0xff] %v670_v39  ;;  %718 = vst [vmem:[%s1186_s30 + $0xa0] sm:$0xff] %v686_v40  ;;  %v671_v43 = vmax.f32 %v559_v41, 0.0  ;;  %v687_v44 = vmax.f32 %v623_v42, 0.0  ;;  %v882_v45 = vpop.f32.mrb[12].mxu0  ;;  %v930_v46 = vpop.f32.mrb[12].mxu1 }
 0x112   : > { %v883_v47 = vpop.f32.mrb[13].mxu0  ;;  %v931_v48 = vpop.f32.mrb[13].mxu1 }
 0x113   : > { %703 = vst [vmem:[%s1186_s30 + $0x28] sm:$0xff] %v671_v43  ;;  %719 = vst [vmem:[%s1186_s30 + $0xa8] sm:$0xff] %v687_v44  ;;  %v884_v49 = vadd.f32 %v883_v47, %v882_v45  ;;  %v932_v51 = vadd.f32 %v931_v48, %v930_v46  ;;  %v885_v52 = vpop.f32.mrb[14].mxu0  ;;  %v933_v53 = vpop.f32.mrb[14].mxu1 }
 0x114   : > { %v886_v54 = vpop.f32.mrb[15].mxu0  ;;  %v934_v55 = vpop.f32.mrb[15].mxu1 }
 0x115   : > { %v564_v56 = vadd.f32 %v884_v49, %v1177_v50  ;;  %v628_v57 = vadd.f32 %v932_v51, %v1177_v50  ;;  %v887_v58 = vadd.f32 %v886_v54, %v885_v52  ;;  %v935_v59 = vadd.f32 %v934_v55, %v933_v53 }
 0x117   : > { %v672_v60 = vmax.f32 %v564_v56, 0.0  ;;  %v688_v61 = vmax.f32 %v628_v57, 0.0  ;;  %v567_v62 = vadd.f32 %v887_v58, %v1177_v50  ;;  %v631_v63 = vadd.f32 %v935_v59, %v1177_v50 }
 0x119   : > { %704 = vst [vmem:[%s1186_s30 + $0x30] sm:$0xff] %v672_v60  ;;  %720 = vst [vmem:[%s1186_s30 + $0xb0] sm:$0xff] %v688_v61  ;;  %v673_v0 = vmax.f32 %v567_v62, 0.0  ;;  %v689_v1 = vmax.f32 %v631_v63, 0.0  ;;  %v888_v2 = vpop.f32.mrb[16].mxu0  ;;  %v936_v3 = vpop.f32.mrb[16].mxu1 }
 0x11a   : > { %v889_v4 = vpop.f32.mrb[17].mxu0  ;;  %v937_v5 = vpop.f32.mrb[17].mxu1 }
 0x11b   : > { %705 = vst [vmem:[%s1186_s30 + $0x38] sm:$0xff] %v673_v0  ;;  %721 = vst [vmem:[%s1186_s30 + $0xb8] sm:$0xff] %v689_v1  ;;  %v890_v6 = vadd.f32 %v889_v4, %v888_v2  ;;  %v938_v7 = vadd.f32 %v937_v5, %v936_v3  ;;  %v891_v8 = vpop.f32.mrb[18].mxu0  ;;  %v939_v9 = vpop.f32.mrb[18].mxu1 }
 0x11c   : > { %v892_v10 = vpop.f32.mrb[19].mxu0  ;;  %v940_v11 = vpop.f32.mrb[19].mxu1 }
 0x11d   : > { %v572_v12 = vadd.f32 %v890_v6, %v1177_v50  ;;  %v636_v13 = vadd.f32 %v938_v7, %v1177_v50  ;;  %v893_v14 = vadd.f32 %v892_v10, %v891_v8  ;;  %v941_v15 = vadd.f32 %v940_v11, %v939_v9 }
 0x11f   : > { %v674_v16 = vmax.f32 %v572_v12, 0.0  ;;  %v690_v17 = vmax.f32 %v636_v13, 0.0  ;;  %v575_v18 = vadd.f32 %v893_v14, %v1177_v50  ;;  %v639_v19 = vadd.f32 %v941_v15, %v1177_v50 }
 0x121   : > { %706 = vst [vmem:[%s1186_s30 + $0x40] sm:$0xff] %v674_v16  ;;  %722 = vst [vmem:[%s1186_s30 + $0xc0] sm:$0xff] %v690_v17  ;;  %v675_v20 = vmax.f32 %v575_v18, 0.0  ;;  %v691_v21 = vmax.f32 %v639_v19, 0.0  ;;  %v894_v22 = vpop.f32.mrb[20].mxu0  ;;  %v942_v23 = vpop.f32.mrb[20].mxu1 }
 0x122   : > { %v895_v24 = vpop.f32.mrb[21].mxu0  ;;  %v943_v25 = vpop.f32.mrb[21].mxu1 }
 0x123   : > { %707 = vst [vmem:[%s1186_s30 + $0x48] sm:$0xff] %v675_v20  ;;  %723 = vst [vmem:[%s1186_s30 + $0xc8] sm:$0xff] %v691_v21  ;;  %v896_v26 = vadd.f32 %v895_v24, %v894_v22  ;;  %v944_v27 = vadd.f32 %v943_v25, %v942_v23  ;;  %v897_v28 = vpop.f32.mrb[22].mxu0  ;;  %v945_v29 = vpop.f32.mrb[22].mxu1 }
 0x124   : > { %v898_v30 = vpop.f32.mrb[23].mxu0  ;;  %v946_v31 = vpop.f32.mrb[23].mxu1 }
 0x125   : > { %v580_v32 = vadd.f32 %v896_v26, %v1177_v50  ;;  %v644_v33 = vadd.f32 %v944_v27, %v1177_v50  ;;  %v899_v34 = vadd.f32 %v898_v30, %v897_v28  ;;  %v947_v35 = vadd.f32 %v946_v31, %v945_v29 }
 0x127   : > { %v676_v36 = vmax.f32 %v580_v32, 0.0  ;;  %v692_v37 = vmax.f32 %v644_v33, 0.0  ;;  %v583_v38 = vadd.f32 %v899_v34, %v1177_v50  ;;  %v647_v39 = vadd.f32 %v947_v35, %v1177_v50 }
 0x129   : > { %708 = vst [vmem:[%s1186_s30 + $0x50] sm:$0xff] %v676_v36  ;;  %724 = vst [vmem:[%s1186_s30 + $0xd0] sm:$0xff] %v692_v37  ;;  %v677_v40 = vmax.f32 %v583_v38, 0.0  ;;  %v693_v41 = vmax.f32 %v647_v39, 0.0  ;;  %v900_v42 = vpop.f32.mrb[24].mxu0  ;;  %v948_v43 = vpop.f32.mrb[24].mxu1 }
 0x12a   : > { %v901_v44 = vpop.f32.mrb[25].mxu0  ;;  %v949_v45 = vpop.f32.mrb[25].mxu1 }
 0x12b   : > { %709 = vst [vmem:[%s1186_s30 + $0x58] sm:$0xff] %v677_v40  ;;  %725 = vst [vmem:[%s1186_s30 + $0xd8] sm:$0xff] %v693_v41  ;;  %v902_v46 = vadd.f32 %v901_v44, %v900_v42  ;;  %v950_v47 = vadd.f32 %v949_v45, %v948_v43  ;;  %v903_v48 = vpop.f32.mrb[26].mxu0  ;;  %v951_v49 = vpop.f32.mrb[26].mxu1 }
 0x12c   : > { %v904_v51 = vpop.f32.mrb[27].mxu0  ;;  %v952_v52 = vpop.f32.mrb[27].mxu1 }
 0x12d   : > { %v588_v53 = vadd.f32 %v902_v46, %v1177_v50  ;;  %v652_v54 = vadd.f32 %v950_v47, %v1177_v50  ;;  %v905_v55 = vadd.f32 %v904_v51, %v903_v48  ;;  %v953_v56 = vadd.f32 %v952_v52, %v951_v49 }
 0x12f   : > { %v678_v57 = vmax.f32 %v588_v53, 0.0  ;;  %v694_v58 = vmax.f32 %v652_v54, 0.0  ;;  %v591_v59 = vadd.f32 %v905_v55, %v1177_v50  ;;  %v655_v60 = vadd.f32 %v953_v56, %v1177_v50 }
 0x131   : > { %710 = vst [vmem:[%s1186_s30 + $0x60] sm:$0xff] %v678_v57  ;;  %726 = vst [vmem:[%s1186_s30 + $0xe0] sm:$0xff] %v694_v58  ;;  %v679_v61 = vmax.f32 %v591_v59, 0.0  ;;  %v695_v62 = vmax.f32 %v655_v60, 0.0  ;;  %v906_v63 = vpop.f32.mrb[28].mxu0  ;;  %v954_v0 = vpop.f32.mrb[28].mxu1 }
 0x132   : > { %v907_v1 = vpop.f32.mrb[29].mxu0  ;;  %v955_v2 = vpop.f32.mrb[29].mxu1 }
 0x133   : > { %711 = vst [vmem:[%s1186_s30 + $0x68] sm:$0xff] %v679_v61  ;;  %727 = vst [vmem:[%s1186_s30 + $0xe8] sm:$0xff] %v695_v62  ;;  %v908_v3 = vadd.f32 %v907_v1, %v906_v63  ;;  %v956_v4 = vadd.f32 %v955_v2, %v954_v0  ;;  %v909_v5 = vpop.f32.mrb[30].mxu0  ;;  %v957_v6 = vpop.f32.mrb[30].mxu1 }
 0x134   : > { %v910_v7 = vpop.f32.mrb[31].mxu0  ;;  %v958_v8 = vpop.f32.mrb[31].mxu1 }
 0x135   : > { %v596_v9 = vadd.f32 %v908_v3, %v1177_v50  ;;  %v660_v10 = vadd.f32 %v956_v4, %v1177_v50  ;;  %v911_v11 = vadd.f32 %v910_v7, %v909_v5  ;;  %v959_v12 = vadd.f32 %v958_v8, %v957_v6 }
 0x137   : > { %v680_v13 = vmax.f32 %v596_v9, 0.0  ;;  %v696_v14 = vmax.f32 %v660_v10, 0.0  ;;  %v599_v15 = vadd.f32 %v911_v11, %v1177_v50  ;;  %v663_v16 = vadd.f32 %v959_v12, %v1177_v50 }
 0x139   : > { %712 = vst [vmem:[%s1186_s30 + $0x70] sm:$0xff] %v680_v13  ;;  %728 = vst [vmem:[%s1186_s30 + $0xf0] sm:$0xff] %v696_v14  ;;  %v681_v17 = vmax.f32 %v599_v15, 0.0  ;;  %v697_v18 = vmax.f32 %v663_v16, 0.0 }
 0x13b   : > { %713 = vst [vmem:[%s1186_s30 + $0x78] sm:$0xff] %v681_v17  ;;  %729 = vst [vmem:[%s1186_s30 + $0xf8] sm:$0xff] %v697_v18 }
 0x13c PF: > { %s13_s12 = sadd.s32 1, %s1054_s12  }
 0x13d   : > { %p10_p4 = scmp.ge.s32.totalorder %s13_s12, 4  }
 0x13f   :  { %12 = sbr.rel (!%p10_p4) target bundleno = 1 (0x1), region = 62 }

// kernel: _lambda_.7
= control target key start
LH: loop header
LB: loop body
LE: loop exit
PB: predicated region body
PF: predicated region fallthrough
CT: control target
= control target key end

     0   :  { %s1319_s15 = smov 0   ;;  %s1518_s0 = inlined_call_operand.vmem [shape: bf16[512,256], index: 0, kind: input, shape index: {}]   ;;  %s1519_s1 = inlined_call_operand.vmem [shape: bf16[256,128], index: 1, kind: input, shape index: {}]   ;;  %s1520_s2 = inlined_call_operand.vmem [shape: f32[1,128], index: 2, kind: input, shape index: {}]   ;;  %s1521_s3 = inlined_call_operand.vmem [shape: bf16[512,128], index: 3, kind: input, shape index: {}]   ;;  %s1522_s4 = inlined_call_operand.vmem [shape: f32[512,128], index: 4, kind: output, shape index: {}]  }
   0x1 LB: > { %s943_s16 = sadd.s32 4294967295, %s1292_s15   ;;  %p947_p0 = scmp.ge.s32.totalorder %s1292_s15, 1  ;;  %s1292_s15 = sphi %s1319_s15, %s14_s15  }
   0x2   : > { %p175_p1 = scmp.lt.s32.totalorder %s1292_s15, 3 }
   0x4   : > { %p176_p2 = pnand %p947_p0, %p175_p1 }
   0x5   : > { %v1222_v0 = vld [vmem:[%s1519_s1 + $0x40] sm:$0xff] (!%p176_p2)   ;;  %s948_s19 = sshll.u32 (!%p176_p2), %s943_s16, 5  ;;  %v1224_v2 = vld [vmem:[%s1519_s1 + $0x48] sm:$0xff] (!%p176_p2)   ;;  %v1226_v4 = vld [vmem:[%s1519_s1 + $0x50] sm:$0xff] (!%p176_p2)  }
   0x6   : > { %179 = sbr.rel (%p176_p2) target bundleno = 319 (0x13f), region = 36  ;;  %v1223_v1 = vld [vmem:[%s1519_s1] sm:$0xff] (!%p176_p2)   ;;  %1086 = vmatprep.subr.bf16.mxu0 (!%p176_p2), %v1222_v0  ;;  %1198 = vmatprep.subr.bf16.mxu1 (!%p176_p2), %v1222_v0  ;;  %v1225_v3 = vld [vmem:[%s1519_s1 + $0x8] sm:$0xff] (!%p176_p2)   ;;  %p208_p3 = scmp.lt.s32.totalorder (!%p176_p2), %s948_s19, 63  ;;  %v1227_v5 = vld [vmem:[%s1519_s1 + $0x10] sm:$0xff] (!%p176_p2)  }
   0x7   : > { %1087 = vmatpush3.bf16.msra.mxu0 (!%p176_p2), %v1223_v1  ;;  %1206 = vmatpush3.bf16.msra.mxu1 (!%p176_p2), %v1223_v1  ;;  %v1228_v6 = vld [vmem:[%s1519_s1 + $0x58] sm:$0xff] (!%p176_p2)   ;;  %v1230_v8 = vld [vmem:[%s1519_s1 + $0x60] sm:$0xff] (!%p176_p2)   ;;  %v1232_v10 = vld [vmem:[%s1519_s1 + $0x68] sm:$0xff] (!%p176_p2)  }
   0x8   : > { %1088 = vmatprep.subr.bf16.mxu0 (!%p176_p2), %v1224_v2  ;;  %1199 = vmatprep.subr.bf16.mxu1 (!%p176_p2), %v1224_v2  ;;  %v1229_v7 = vld [vmem:[%s1519_s1 + $0x18] sm:$0xff] (!%p176_p2)   ;;  %v1231_v9 = vld [vmem:[%s1519_s1 + $0x20] sm:$0xff] (!%p176_p2)   ;;  %v1233_v13 = vld [vmem:[%s1519_s1 + $0x28] sm:$0xff] (!%p176_p2)  }
   0x9   : > { %v1234_v14 = vld [vmem:[%s1519_s1 + $0x70] sm:$0xff] (!%p176_p2)   ;;  %v1236_v16 = vld [vmem:[%s1519_s1 + $0x78] sm:$0xff] (!%p176_p2)   ;;  %v1428_v52 = vld [vmem:[%s1520_s2] ss:$0 sm:$0xff] (!%p176_p2) }
   0xa   : > { %v1235_v15 = vld [vmem:[%s1519_s1 + $0x30] sm:$0xff] (!%p176_p2)   ;;  %v1237_v17 = vld [vmem:[%s1519_s1 + $0x38] sm:$0xff] (!%p176_p2)  }
   0xb   : > { %1089 = vmatpush3.bf16.msra.mxu0 (!%p176_p2), %v1225_v3  ;;  %1207 = vmatpush3.bf16.msra.mxu1 (!%p176_p2), %v1225_v3 }
   0xc   : > { %1090 = vmatprep.subr.bf16.mxu0 (!%p176_p2), %v1226_v4  ;;  %1200 = vmatprep.subr.bf16.mxu1 (!%p176_p2), %v1226_v4 }
   0xd   : > { %s1524_s19 = smov (!%p208_p3, %s948_s19), 63 }
   0xe   : > { %s1006_s8 = sshll.u32 %s1524_s19, 3  ;;  %s952_s30 = sshll.u32 %s1524_s19, 2 }
   0xf   : > { %1091 = vmatpush3.bf16.msra.mxu0 %v1227_v5  ;;  %1208 = vmatpush3.bf16.msra.mxu1 %v1227_v5  ;;  %s1362_s13 = scalar_lea.vmem %s1518_s0, %s1006_s8  ;;  %s1421_s7 = scalar_lea.vmem %s1521_s3, %s952_s30 }
  0x10   : > { %1092 = vmatprep.subr.bf16.mxu0 %v1228_v6  ;;  %1201 = vmatprep.subr.bf16.mxu1 %v1228_v6  ;;  %v1240_v11 = vld [vmem:[%s1362_s13 + $0x4] ss:$8 sps:$4 sm:$0xff]   ;;  %v1238_v18 = vld [vmem:[%s1362_s13] ss:$8 sps:$4 sm:$0xff]   ;;  %v1244_v20 = vld [vmem:[%s1362_s13 + $0x14] ss:$8 sps:$4 sm:$0xff]  }
  0x11   : > { %v1243_v12 = vld [vmem:[%s1362_s13 + $0x84] ss:$8 sps:$4 sm:$0xff]   ;;  %586 = vmatprep.mubr.bf16.mxu0 %v1240_v11  ;;  %v1241_v19 = vld [vmem:[%s1362_s13 + $0x80] ss:$8 sps:$4 sm:$0xff]   ;;  %v1246_v21 = vld [vmem:[%s1362_s13 + $0x94] ss:$8 sps:$4 sm:$0xff]  }
  0x12   : > { %650 = vmatprep.mubr.bf16.mxu1 %v1243_v12  ;;  %v1248_v22 = vld [vmem:[%s1362_s13 + $0x10] ss:$8 sps:$4 sm:$0xff]   ;;  %v1250_v24 = vld [vmem:[%s1362_s13 + $0x24] ss:$8 sps:$4 sm:$0xff]   ;;  %v1254_v26 = vld [vmem:[%s1362_s13 + $0x20] ss:$8 sps:$4 sm:$0xff]  }
  0x13   : > { %1093 = vmatpush3.bf16.msra.mxu0 %v1229_v7  ;;  %1209 = vmatpush3.bf16.msra.mxu1 %v1229_v7  ;;  %v1249_v23 = vld [vmem:[%s1362_s13 + $0x90] ss:$8 sps:$4 sm:$0xff]   ;;  %v1252_v25 = vld [vmem:[%s1362_s13 + $0xa4] ss:$8 sps:$4 sm:$0xff]   ;;  %v1255_v27 = vld [vmem:[%s1362_s13 + $0xa0] ss:$8 sps:$4 sm:$0xff]  }
  0x14   : > { %1094 = vmatprep.subr.bf16.mxu0 %v1230_v8  ;;  %1202 = vmatprep.subr.bf16.mxu1 %v1230_v8  ;;  %v1256_v28 = vld [vmem:[%s1362_s13 + $0x34] ss:$8 sps:$4 sm:$0xff]   ;;  %v1260_v30 = vld [vmem:[%s1362_s13 + $0x30] ss:$8 sps:$4 sm:$0xff]   ;;  %v1262_v32 = vld [vmem:[%s1362_s13 + $0x44] ss:$8 sps:$4 sm:$0xff]  }
  0x15   : > { %v1258_v29 = vld [vmem:[%s1362_s13 + $0xb4] ss:$8 sps:$4 sm:$0xff]   ;;  %v1261_v31 = vld [vmem:[%s1362_s13 + $0xb0] ss:$8 sps:$4 sm:$0xff]   ;;  %v1264_v33 = vld [vmem:[%s1362_s13 + $0xc4] ss:$8 sps:$4 sm:$0xff]  }
  0x16   : > { %v1266_v34 = vld [vmem:[%s1362_s13 + $0x40] ss:$8 sps:$4 sm:$0xff]   ;;  %v1268_v36 = vld [vmem:[%s1362_s13 + $0x54] ss:$8 sps:$4 sm:$0xff]   ;;  %v1272_v38 = vld [vmem:[%s1362_s13 + $0x50] ss:$8 sps:$4 sm:$0xff]  }
  0x17   : > { %1095 = vmatpush3.bf16.msra.mxu0 %v1231_v9  ;;  %1210 = vmatpush3.bf16.msra.mxu1 %v1231_v9  ;;  %v1267_v35 = vld [vmem:[%s1362_s13 + $0xc0] ss:$8 sps:$4 sm:$0xff]   ;;  %v1270_v37 = vld [vmem:[%s1362_s13 + $0xd4] ss:$8 sps:$4 sm:$0xff]   ;;  %v1273_v39 = vld [vmem:[%s1362_s13 + $0xd0] ss:$8 sps:$4 sm:$0xff]  }
  0x18   : > { %1096 = vmatprep.subr.bf16.mxu0 %v1232_v10  ;;  %1203 = vmatprep.subr.bf16.mxu1 %v1232_v10  ;;  %v1274_v40 = vld [vmem:[%s1362_s13 + $0x64] ss:$8 sps:$4 sm:$0xff]   ;;  %v1278_v42 = vld [vmem:[%s1362_s13 + $0x60] ss:$8 sps:$4 sm:$0xff]   ;;  %v1280_v44 = vld [vmem:[%s1362_s13 + $0x74] ss:$8 sps:$4 sm:$0xff]  }
  0x19   : > { %v1276_v41 = vld [vmem:[%s1362_s13 + $0xe4] ss:$8 sps:$4 sm:$0xff]   ;;  %v1279_v43 = vld [vmem:[%s1362_s13 + $0xe0] ss:$8 sps:$4 sm:$0xff]   ;;  %v1282_v45 = vld [vmem:[%s1362_s13 + $0xf4] ss:$8 sps:$4 sm:$0xff]  }
  0x1a   : > { %v1284_v46 = vld [vmem:[%s1362_s13 + $0x70] ss:$8 sps:$4 sm:$0xff]   ;;  %v1008_v48 = vld [vmem:[%s1421_s7] sm:$0xff]   ;;  %v1071_v9 = vld [vmem:[%s1421_s7 + $0x8] sm:$0xff]  }
  0x1b   : > { %1097 = vmatpush3.bf16.msra.mxu0 %v1233_v13  ;;  %1211 = vmatpush3.bf16.msra.mxu1 %v1233_v13  ;;  %v1285_v47 = vld [vmem:[%s1362_s13 + $0xf0] ss:$8 sps:$4 sm:$0xff]   ;;  %v1078_v49 = vld [vmem:[%s1421_s7 + $0x40] sm:$0xff]   ;;  %v1009_v56 = vunpack.c.l.bf16 %v1008_v48  ;;  %v1010_v62 = vunpack.c.h.bf16 %v1008_v48  ;;  %v1079_v10 = vld [vmem:[%s1421_s7 + $0x48] sm:$0xff]   ;;  %s1441_s13 = scalar_lea.vmem %s1522_s4, %s1006_s8 }
  0x1c   : > { %1098 = vmatprep.subr.bf16.mxu0 %v1234_v14  ;;  %1204 = vmatprep.subr.bf16.mxu1 %v1234_v14  ;;  %v1041_v58 = vunpack.c.l.bf16 %v1078_v49  ;;  %v1042_v0 = vunpack.c.h.bf16 %v1078_v49 }
  0x1f   : > { %1099 = vmatpush3.bf16.msra.mxu0 %v1235_v15  ;;  %1212 = vmatpush3.bf16.msra.mxu1 %v1235_v15 }
  0x20   : > { %1100 = vmatprep.subr.bf16.mxu0 %v1236_v16  ;;  %1205 = vmatprep.subr.bf16.mxu1 %v1236_v16 }
  0x23   : > { %1101 = vmatpush3.bf16.msra.mxu0 %v1237_v17  ;;  %1213 = vmatpush3.bf16.msra.mxu1 %v1237_v17 }
  0x26   : > { %587 = vmatmul.mubr.bf16.vlgmr.msra.gmra.mrb[0].mxu0 %v1238_v18  ;;  %651 = vmatmul.mubr.bf16.vlgmr.msra.gmra.mrb[0].mxu1 %v1241_v19  ;;  %v1013_v18 = vunpack.c.l.bf16 %v1071_v9 }
  0x27   : > { %594 = vmatprep.mubr.bf16.mxu0 %v1244_v20  ;;  %658 = vmatprep.mubr.bf16.mxu1 %v1246_v21  ;;  %v1045_v20 = vunpack.c.l.bf16 %v1079_v10 }
  0x2e   : > { %595 = vmatmul.mubr.bf16.gmra.mrb[4].mxu0 %v1248_v22  ;;  %659 = vmatmul.mubr.bf16.gmra.mrb[4].mxu1 %v1249_v23 }
  0x2f   : > { %602 = vmatprep.mubr.bf16.mxu0 %v1250_v24  ;;  %666 = vmatprep.mubr.bf16.mxu1 %v1252_v25 }
  0x36   : > { %603 = vmatmul.mubr.bf16.gmra.mrb[8].mxu0 %v1254_v26  ;;  %667 = vmatmul.mubr.bf16.gmra.mrb[8].mxu1 %v1255_v27 }
  0x37   : > { %610 = vmatprep.mubr.bf16.mxu0 %v1256_v28  ;;  %674 = vmatprep.mubr.bf16.mxu1 %v1258_v29  ;;  %v1014_v28 = vunpack.c.h.bf16 %v1071_v9 }
  0x3e   : > { %611 = vmatmul.mubr.bf16.gmra.mrb[12].mxu0 %v1260_v30  ;;  %675 = vmatmul.mubr.bf16.gmra.mrb[12].mxu1 %v1261_v31  ;;  %v1046_v30 = vunpack.c.h.bf16 %v1079_v10 }
  0x3f   : > { %618 = vmatprep.mubr.bf16.mxu0 %v1262_v32  ;;  %682 = vmatprep.mubr.bf16.mxu1 %v1264_v33 }
  0x46   : > { %619 = vmatmul.mubr.bf16.gmra.mrb[16].mxu0 %v1266_v34  ;;  %683 = vmatmul.mubr.bf16.gmra.mrb[16].mxu1 %v1267_v35 }
  0x47   : > { %626 = vmatprep.mubr.bf16.mxu0 %v1268_v36  ;;  %690 = vmatprep.mubr.bf16.mxu1 %v1270_v37 }
  0x4e   : > { %627 = vmatmul.mubr.bf16.gmra.mrb[20].mxu0 %v1272_v38  ;;  %691 = vmatmul.mubr.bf16.gmra.mrb[20].mxu1 %v1273_v39  ;;  %v1072_v39 = vld [vmem:[%s1421_s7 + $0x10] sm:$0xff]  }
  0x4f   : > { %634 = vmatprep.mubr.bf16.mxu0 %v1274_v40  ;;  %698 = vmatprep.mubr.bf16.mxu1 %v1276_v41  ;;  %v1080_v40 = vld [vmem:[%s1421_s7 + $0x50] sm:$0xff]   ;;  %v1017_v48 = vunpack.c.l.bf16 %v1072_v39 }
  0x56   : > { %635 = vmatmul.mubr.bf16.gmra.mrb[24].mxu0 %v1278_v42  ;;  %699 = vmatmul.mubr.bf16.gmra.mrb[24].mxu1 %v1279_v43 }
  0x57   : > { %642 = vmatprep.mubr.bf16.mxu0 %v1280_v44  ;;  %706 = vmatprep.mubr.bf16.mxu1 %v1282_v45 }
  0x5e   : > { %643 = vmatmul.mubr.bf16.gmra.mrb[28].mxu0 %v1284_v46  ;;  %707 = vmatmul.mubr.bf16.gmra.mrb[28].mxu1 %v1285_v47 }
  0xf9   : > { %v1102_v50 = vpop.f32.mrb[0].mxu0  ;;  %v1150_v51 = vpop.f32.mrb[0].mxu1 }
  0xfa   : > { %v1103_v53 = vpop.f32.mrb[1].mxu0  ;;  %v1151_v54 = vpop.f32.mrb[1].mxu1 }
  0xfb   : > { %v1104_v55 = vadd.f32 %v1103_v53, %v1102_v50  ;;  %v1152_v57 = vadd.f32 %v1151_v54, %v1150_v51  ;;  %v1105_v59 = vpop.f32.mrb[2].mxu0  ;;  %v1153_v60 = vpop.f32.mrb[2].mxu1  ;;  %v1049_v50 = vunpack.c.l.bf16 %v1080_v40 }
  0xfc   : > { %v1106_v61 = vpop.f32.mrb[3].mxu0  ;;  %v1154_v63 = vpop.f32.mrb[3].mxu1 }
  0xfd   : > { %v589_v1 = vadd.f32 %v1104_v55, %v1428_v52  ;;  %v653_v2 = vadd.f32 %v1152_v57, %v1428_v52  ;;  %v1107_v3 = vadd.f32 %v1106_v61, %v1105_v59  ;;  %v1155_v4 = vadd.f32 %v1154_v63, %v1153_v60 }
  0xfe   : > { %v1018_v59 = vunpack.c.h.bf16 %v1072_v39  ;;  %v1050_v61 = vunpack.c.h.bf16 %v1080_v40 }
  0xff   : > { %v779_v5 = vadd.f32 %v1009_v56, %v589_v1  ;;  %v795_v6 = vadd.f32 %v1041_v58, %v653_v2  ;;  %v592_v7 = vadd.f32 %v1107_v3, %v1428_v52  ;;  %v656_v8 = vadd.f32 %v1155_v4, %v1428_v52 }
 0x101   : > { %v811_v11 = vmax.f32 %v779_v5, 0.0  ;;  %v827_v12 = vmax.f32 %v795_v6, 0.0  ;;  %v780_v13 = vadd.f32 %v1010_v62, %v592_v7  ;;  %v796_v14 = vadd.f32 %v1042_v0, %v656_v8  ;;  %v1108_v15 = vpop.f32.mrb[4].mxu0  ;;  %v1156_v16 = vpop.f32.mrb[4].mxu1  ;;  %v1073_v6 = vld [vmem:[%s1421_s7 + $0x18] sm:$0xff]  }
 0x102   : > { %v1109_v17 = vpop.f32.mrb[5].mxu0  ;;  %v1157_v19 = vpop.f32.mrb[5].mxu1  ;;  %v1081_v7 = vld [vmem:[%s1421_s7 + $0x58] sm:$0xff]  }
 0x103   : > { %843 = vst [vmem:[%s1441_s13] sm:$0xff] %v811_v11  ;;  %859 = vst [vmem:[%s1441_s13 + $0x80] sm:$0xff] %v827_v12  ;;  %v812_v21 = vmax.f32 %v780_v13, 0.0  ;;  %v828_v22 = vmax.f32 %v796_v14, 0.0  ;;  %v1110_v23 = vadd.f32 %v1109_v17, %v1108_v15  ;;  %v1158_v24 = vadd.f32 %v1157_v19, %v1156_v16  ;;  %v1111_v25 = vpop.f32.mrb[6].mxu0  ;;  %v1159_v26 = vpop.f32.mrb[6].mxu1 }
 0x104   : > { %v1112_v27 = vpop.f32.mrb[7].mxu0  ;;  %v1160_v29 = vpop.f32.mrb[7].mxu1  ;;  %v1021_v15 = vunpack.c.l.bf16 %v1073_v6  ;;  %v1053_v17 = vunpack.c.l.bf16 %v1081_v7 }
 0x105   : > { %844 = vst [vmem:[%s1441_s13 + $0x8] sm:$0xff] %v812_v21  ;;  %860 = vst [vmem:[%s1441_s13 + $0x88] sm:$0xff] %v828_v22  ;;  %v597_v31 = vadd.f32 %v1110_v23, %v1428_v52  ;;  %v661_v32 = vadd.f32 %v1158_v24, %v1428_v52  ;;  %v1113_v33 = vadd.f32 %v1112_v27, %v1111_v25  ;;  %v1022_v25 = vunpack.c.h.bf16 %v1073_v6 }
 0x106   : > { %v1161_v34 = vadd.f32 %v1160_v29, %v1159_v26  ;;  %v1054_v27 = vunpack.c.h.bf16 %v1081_v7 }
 0x107   : > { %v781_v35 = vadd.f32 %v1013_v18, %v597_v31  ;;  %v797_v36 = vadd.f32 %v1045_v20, %v661_v32  ;;  %v600_v37 = vadd.f32 %v1113_v33, %v1428_v52 }
 0x108   : > { %v664_v38 = vadd.f32 %v1161_v34, %v1428_v52 }
 0x109   : > { %v813_v41 = vmax.f32 %v781_v35, 0.0  ;;  %v829_v42 = vmax.f32 %v797_v36, 0.0  ;;  %v782_v43 = vadd.f32 %v1014_v28, %v600_v37  ;;  %v1114_v45 = vpop.f32.mrb[8].mxu0  ;;  %v1162_v46 = vpop.f32.mrb[8].mxu1  ;;  %v1074_v36 = vld [vmem:[%s1421_s7 + $0x20] sm:$0xff]  }
 0x10a   : > { %v798_v44 = vadd.f32 %v1046_v30, %v664_v38  ;;  %v1115_v47 = vpop.f32.mrb[9].mxu0  ;;  %v1163_v49 = vpop.f32.mrb[9].mxu1  ;;  %v1082_v37 = vld [vmem:[%s1421_s7 + $0x60] sm:$0xff]  }
 0x10b   : > { %845 = vst [vmem:[%s1441_s13 + $0x10] sm:$0xff] %v813_v41  ;;  %861 = vst [vmem:[%s1441_s13 + $0x90] sm:$0xff] %v829_v42  ;;  %v814_v51 = vmax.f32 %v782_v43, 0.0  ;;  %v1116_v54 = vadd.f32 %v1115_v47, %v1114_v45  ;;  %v1164_v55 = vadd.f32 %v1163_v49, %v1162_v46  ;;  %v1117_v56 = vpop.f32.mrb[10].mxu0  ;;  %v1165_v57 = vpop.f32.mrb[10].mxu1  ;;  %v1025_v45 = vunpack.c.l.bf16 %v1074_v36 }
 0x10c   : > { %v830_v53 = vmax.f32 %v798_v44, 0.0  ;;  %v1118_v58 = vpop.f32.mrb[11].mxu0  ;;  %v1166_v60 = vpop.f32.mrb[11].mxu1  ;;  %v1057_v47 = vunpack.c.l.bf16 %v1082_v37 }
 0x10d   : > { %846 = vst [vmem:[%s1441_s13 + $0x18] sm:$0xff] %v814_v51  ;;  %v605_v62 = vadd.f32 %v1116_v54, %v1428_v52  ;;  %v669_v63 = vadd.f32 %v1164_v55, %v1428_v52  ;;  %v1119_v0 = vadd.f32 %v1118_v58, %v1117_v56  ;;  %v1167_v1 = vadd.f32 %v1166_v60, %v1165_v57 }
 0x10e   : > { %862 = vst [vmem:[%s1441_s13 + $0x98] sm:$0xff] %v830_v53  ;;  %v1026_v56 = vunpack.c.h.bf16 %v1074_v36  ;;  %v1058_v58 = vunpack.c.h.bf16 %v1082_v37 }
 0x10f   : > { %v783_v2 = vadd.f32 %v1017_v48, %v605_v62  ;;  %v799_v3 = vadd.f32 %v1049_v50, %v669_v63  ;;  %v608_v4 = vadd.f32 %v1119_v0, %v1428_v52  ;;  %v672_v5 = vadd.f32 %v1167_v1, %v1428_v52 }
 0x111   : > { %v815_v8 = vmax.f32 %v783_v2, 0.0  ;;  %v831_v9 = vmax.f32 %v799_v3, 0.0  ;;  %v784_v10 = vadd.f32 %v1018_v59, %v608_v4  ;;  %v800_v11 = vadd.f32 %v1050_v61, %v672_v5  ;;  %v1120_v12 = vpop.f32.mrb[12].mxu0  ;;  %v1168_v13 = vpop.f32.mrb[12].mxu1  ;;  %v1075_v3 = vld [vmem:[%s1421_s7 + $0x28] sm:$0xff]  }
 0x112   : > { %v1121_v14 = vpop.f32.mrb[13].mxu0  ;;  %v1169_v16 = vpop.f32.mrb[13].mxu1  ;;  %v1083_v4 = vld [vmem:[%s1421_s7 + $0x68] sm:$0xff]  }
 0x113   : > { %847 = vst [vmem:[%s1441_s13 + $0x20] sm:$0xff] %v815_v8  ;;  %863 = vst [vmem:[%s1441_s13 + $0xa0] sm:$0xff] %v831_v9  ;;  %v816_v18 = vmax.f32 %v784_v10, 0.0  ;;  %v832_v19 = vmax.f32 %v800_v11, 0.0  ;;  %v1122_v20 = vadd.f32 %v1121_v14, %v1120_v12  ;;  %v1170_v21 = vadd.f32 %v1169_v16, %v1168_v13  ;;  %v1123_v22 = vpop.f32.mrb[14].mxu0  ;;  %v1171_v23 = vpop.f32.mrb[14].mxu1 }
 0x114   : > { %v1124_v24 = vpop.f32.mrb[15].mxu0  ;;  %v1172_v26 = vpop.f32.mrb[15].mxu1  ;;  %v1029_v12 = vunpack.c.l.bf16 %v1075_v3  ;;  %v1061_v14 = vunpack.c.l.bf16 %v1083_v4 }
 0x115   : > { %848 = vst [vmem:[%s1441_s13 + $0x28] sm:$0xff] %v816_v18  ;;  %864 = vst [vmem:[%s1441_s13 + $0xa8] sm:$0xff] %v832_v19  ;;  %v613_v28 = vadd.f32 %v1122_v20, %v1428_v52  ;;  %v677_v29 = vadd.f32 %v1170_v21, %v1428_v52  ;;  %v1125_v30 = vadd.f32 %v1124_v24, %v1123_v22  ;;  %v1030_v22 = vunpack.c.h.bf16 %v1075_v3 }
 0x116   : > { %v1173_v31 = vadd.f32 %v1172_v26, %v1171_v23  ;;  %v1062_v24 = vunpack.c.h.bf16 %v1083_v4 }
 0x117   : > { %v785_v32 = vadd.f32 %v1021_v15, %v613_v28  ;;  %v801_v33 = vadd.f32 %v1053_v17, %v677_v29  ;;  %v616_v34 = vadd.f32 %v1125_v30, %v1428_v52 }
 0x118   : > { %v680_v35 = vadd.f32 %v1173_v31, %v1428_v52 }
 0x119   : > { %v817_v38 = vmax.f32 %v785_v32, 0.0  ;;  %v833_v39 = vmax.f32 %v801_v33, 0.0  ;;  %v786_v40 = vadd.f32 %v1022_v25, %v616_v34  ;;  %v1126_v42 = vpop.f32.mrb[16].mxu0  ;;  %v1174_v43 = vpop.f32.mrb[16].mxu1  ;;  %v1076_v33 = vld [vmem:[%s1421_s7 + $0x30] sm:$0xff]  }
 0x11a   : > { %v802_v41 = vadd.f32 %v1054_v27, %v680_v35  ;;  %v1127_v44 = vpop.f32.mrb[17].mxu0  ;;  %v1175_v46 = vpop.f32.mrb[17].mxu1  ;;  %v1084_v34 = vld [vmem:[%s1421_s7 + $0x70] sm:$0xff]  }
 0x11b   : > { %849 = vst [vmem:[%s1441_s13 + $0x30] sm:$0xff] %v817_v38  ;;  %865 = vst [vmem:[%s1441_s13 + $0xb0] sm:$0xff] %v833_v39  ;;  %v818_v48 = vmax.f32 %v786_v40, 0.0  ;;  %v1128_v50 = vadd.f32 %v1127_v44, %v1126_v42  ;;  %v1176_v51 = vadd.f32 %v1175_v46, %v1174_v43  ;;  %v1129_v53 = vpop.f32.mrb[18].mxu0  ;;  %v1177_v54 = vpop.f32.mrb[18].mxu1  ;;  %v1033_v42 = vunpack.c.l.bf16 %v1076_v33 }
 0x11c   : > { %v834_v49 = vmax.f32 %v802_v41, 0.0  ;;  %v1130_v55 = vpop.f32.mrb[19].mxu0  ;;  %v1178_v57 = vpop.f32.mrb[19].mxu1  ;;  %v1065_v44 = vunpack.c.l.bf16 %v1084_v34 }
 0x11d   : > { %850 = vst [vmem:[%s1441_s13 + $0x38] sm:$0xff] %v818_v48  ;;  %v621_v59 = vadd.f32 %v1128_v50, %v1428_v52  ;;  %v685_v60 = vadd.f32 %v1176_v51, %v1428_v52  ;;  %v1131_v61 = vadd.f32 %v1130_v55, %v1129_v53  ;;  %v1179_v62 = vadd.f32 %v1178_v57, %v1177_v54 }
 0x11e   : > { %866 = vst [vmem:[%s1441_s13 + $0xb8] sm:$0xff] %v834_v49  ;;  %v1034_v53 = vunpack.c.h.bf16 %v1076_v33  ;;  %v1066_v55 = vunpack.c.h.bf16 %v1084_v34 }
 0x11f   : > { %v787_v63 = vadd.f32 %v1025_v45, %v621_v59  ;;  %v803_v0 = vadd.f32 %v1057_v47, %v685_v60  ;;  %v624_v1 = vadd.f32 %v1131_v61, %v1428_v52  ;;  %v688_v2 = vadd.f32 %v1179_v62, %v1428_v52 }
 0x121   : > { %v819_v5 = vmax.f32 %v787_v63, 0.0  ;;  %v835_v6 = vmax.f32 %v803_v0, 0.0  ;;  %v788_v7 = vadd.f32 %v1026_v56, %v624_v1  ;;  %v804_v8 = vadd.f32 %v1058_v58, %v688_v2  ;;  %v1132_v9 = vpop.f32.mrb[20].mxu0  ;;  %v1180_v10 = vpop.f32.mrb[20].mxu1  ;;  %v1077_v0 = vld [vmem:[%s1421_s7 + $0x38] sm:$0xff]  }
 0x122   : > { %v1133_v11 = vpop.f32.mrb[21].mxu0  ;;  %v1181_v13 = vpop.f32.mrb[21].mxu1  ;;  %v1085_v1 = vld [vmem:[%s1421_s7 + $0x78] sm:$0xff]  }
 0x123   : > { %851 = vst [vmem:[%s1441_s13 + $0x40] sm:$0xff] %v819_v5  ;;  %867 = vst [vmem:[%s1441_s13 + $0xc0] sm:$0xff] %v835_v6  ;;  %v820_v15 = vmax.f32 %v788_v7, 0.0  ;;  %v836_v16 = vmax.f32 %v804_v8, 0.0  ;;  %v1134_v17 = vadd.f32 %v1133_v11, %v1132_v9  ;;  %v1182_v18 = vadd.f32 %v1181_v13, %v1180_v10  ;;  %v1135_v19 = vpop.f32.mrb[22].mxu0  ;;  %v1183_v20 = vpop.f32.mrb[22].mxu1 }
 0x124   : > { %v1136_v21 = vpop.f32.mrb[23].mxu0  ;;  %v1184_v23 = vpop.f32.mrb[23].mxu1  ;;  %v1037_v9 = vunpack.c.l.bf16 %v1077_v0  ;;  %v1069_v11 = vunpack.c.l.bf16 %v1085_v1 }
 0x125   : > { %852 = vst [vmem:[%s1441_s13 + $0x48] sm:$0xff] %v820_v15  ;;  %868 = vst [vmem:[%s1441_s13 + $0xc8] sm:$0xff] %v836_v16  ;;  %v629_v25 = vadd.f32 %v1134_v17, %v1428_v52  ;;  %v693_v26 = vadd.f32 %v1182_v18, %v1428_v52  ;;  %v1137_v27 = vadd.f32 %v1136_v21, %v1135_v19  ;;  %v1038_v19 = vunpack.c.h.bf16 %v1077_v0 }
 0x126   : > { %v1185_v28 = vadd.f32 %v1184_v23, %v1183_v20  ;;  %v1070_v21 = vunpack.c.h.bf16 %v1085_v1 }
 0x127   : > { %v789_v29 = vadd.f32 %v1029_v12, %v629_v25  ;;  %v805_v30 = vadd.f32 %v1061_v14, %v693_v26  ;;  %v632_v31 = vadd.f32 %v1137_v27, %v1428_v52 }
 0x128   : > { %v696_v32 = vadd.f32 %v1185_v28, %v1428_v52 }
 0x129   : > { %v821_v35 = vmax.f32 %v789_v29, 0.0  ;;  %v837_v36 = vmax.f32 %v805_v30, 0.0  ;;  %v790_v37 = vadd.f32 %v1030_v22, %v632_v31  ;;  %v1138_v39 = vpop.f32.mrb[24].mxu0  ;;  %v1186_v40 = vpop.f32.mrb[24].mxu1 }
 0x12a   : > { %v806_v38 = vadd.f32 %v1062_v24, %v696_v32  ;;  %v1139_v41 = vpop.f32.mrb[25].mxu0  ;;  %v1187_v43 = vpop.f32.mrb[25].mxu1 }
 0x12b   : > { %853 = vst [vmem:[%s1441_s13 + $0x50] sm:$0xff] %v821_v35  ;;  %869 = vst [vmem:[%s1441_s13 + $0xd0] sm:$0xff] %v837_v36  ;;  %v822_v45 = vmax.f32 %v790_v37, 0.0  ;;  %v1140_v47 = vadd.f32 %v1139_v41, %v1138_v39  ;;  %v1188_v48 = vadd.f32 %v1187_v43, %v1186_v40  ;;  %v1141_v49 = vpop.f32.mrb[26].mxu0  ;;  %v1189_v50 = vpop.f32.mrb[26].mxu1 }
 0x12c   : > { %v838_v46 = vmax.f32 %v806_v38, 0.0  ;;  %v1142_v51 = vpop.f32.mrb[27].mxu0  ;;  %v1190_v54 = vpop.f32.mrb[27].mxu1 }
 0x12d   : > { %854 = vst [vmem:[%s1441_s13 + $0x58] sm:$0xff] %v822_v45  ;;  %v637_v56 = vadd.f32 %v1140_v47, %v1428_v52  ;;  %v701_v57 = vadd.f32 %v1188_v48, %v1428_v52  ;;  %v1143_v58 = vadd.f32 %v1142_v51, %v1141_v49  ;;  %v1191_v59 = vadd.f32 %v1190_v54, %v1189_v50 }
 0x12e   : > { %870 = vst [vmem:[%s1441_s13 + $0xd8] sm:$0xff] %v838_v46 }
 0x12f   : > { %v791_v60 = vadd.f32 %v1033_v42, %v637_v56  ;;  %v807_v61 = vadd.f32 %v1065_v44, %v701_v57  ;;  %v640_v62 = vadd.f32 %v1143_v58, %v1428_v52  ;;  %v704_v63 = vadd.f32 %v1191_v59, %v1428_v52 }
 0x131   : > { %v823_v2 = vmax.f32 %v791_v60, 0.0  ;;  %v839_v3 = vmax.f32 %v807_v61, 0.0  ;;  %v792_v4 = vadd.f32 %v1034_v53, %v640_v62  ;;  %v808_v5 = vadd.f32 %v1066_v55, %v704_v63  ;;  %v1144_v6 = vpop.f32.mrb[28].mxu0  ;;  %v1192_v7 = vpop.f32.mrb[28].mxu1 }
 0x132   : > { %v1145_v8 = vpop.f32.mrb[29].mxu0  ;;  %v1193_v10 = vpop.f32.mrb[29].mxu1 }
 0x133   : > { %855 = vst [vmem:[%s1441_s13 + $0x60] sm:$0xff] %v823_v2  ;;  %871 = vst [vmem:[%s1441_s13 + $0xe0] sm:$0xff] %v839_v3  ;;  %v824_v12 = vmax.f32 %v792_v4, 0.0  ;;  %v840_v13 = vmax.f32 %v808_v5, 0.0  ;;  %v1146_v14 = vadd.f32 %v1145_v8, %v1144_v6  ;;  %v1194_v15 = vadd.f32 %v1193_v10, %v1192_v7  ;;  %v1147_v16 = vpop.f32.mrb[30].mxu0  ;;  %v1195_v17 = vpop.f32.mrb[30].mxu1 }
 0x134   : > { %v1148_v18 = vpop.f32.mrb[31].mxu0  ;;  %v1196_v20 = vpop.f32.mrb[31].mxu1 }
 0x135   : > { %856 = vst [vmem:[%s1441_s13 + $0x68] sm:$0xff] %v824_v12  ;;  %872 = vst [vmem:[%s1441_s13 + $0xe8] sm:$0xff] %v840_v13  ;;  %v645_v22 = vadd.f32 %v1146_v14, %v1428_v52  ;;  %v709_v23 = vadd.f32 %v1194_v15, %v1428_v52  ;;  %v1149_v24 = vadd.f32 %v1148_v18, %v1147_v16 }
 0x136   : > { %v1197_v25 = vadd.f32 %v1196_v20, %v1195_v17 }
 0x137   : > { %v793_v26 = vadd.f32 %v1037_v9, %v645_v22  ;;  %v809_v27 = vadd.f32 %v1069_v11, %v709_v23  ;;  %v648_v28 = vadd.f32 %v1149_v24, %v1428_v52 }
 0x138   : > { %v712_v29 = vadd.f32 %v1197_v25, %v1428_v52 }
 0x139   : > { %v825_v30 = vmax.f32 %v793_v26, 0.0  ;;  %v841_v31 = vmax.f32 %v809_v27, 0.0  ;;  %v794_v32 = vadd.f32 %v1038_v19, %v648_v28 }
 0x13a   : > { %v810_v33 = vadd.f32 %v1070_v21, %v712_v29 }
 0x13b   : > { %857 = vst [vmem:[%s1441_s13 + $0x70] sm:$0xff] %v825_v30  ;;  %873 = vst [vmem:[%s1441_s13 + $0xf0] sm:$0xff] %v841_v31  ;;  %v826_v34 = vmax.f32 %v794_v32, 0.0 }
 0x13c   : > { %v842_v35 = vmax.f32 %v810_v33, 0.0 }
 0x13d   : > { %858 = vst [vmem:[%s1441_s13 + $0x78] sm:$0xff] %v826_v34 }
 0x13e   : > { %874 = vst [vmem:[%s1441_s13 + $0xf8] sm:$0xff] %v842_v35 }
 0x13f PF: > { %s14_s15 = sadd.s32 1, %s1292_s15  }
 0x140   : > { %p11_p4 = scmp.ge.s32.totalorder %s14_s15, 4  }
 0x142   :  { %13 = sbr.rel (!%p11_p4) target bundleno = 1 (0x1), region = 69 }

// kernel: _lambda_.8
= control target key start
LH: loop header
LB: loop body
LE: loop exit
PB: predicated region body
PF: predicated region fallthrough
CT: control target
= control target key end

     0   :  { %s706_s15 = smov 0   ;;  %s812_s0 = inlined_call_operand.vmem [shape: bf16[128,256], index: 0, kind: input, shape index: {}]   ;;  %s813_s1 = inlined_call_operand.vmem [shape: bf16[256,128], index: 1, kind: input, shape index: {}]   ;;  %s814_s2 = inlined_call_operand.vmem [shape: f32[1,128], index: 2, kind: input, shape index: {}]   ;;  %s815_s3 = inlined_call_operand.vmem [shape: f32[1,128], index: 3, kind: input, shape index: {}]   ;;  %s816_s4 = inlined_call_operand.vmem [shape: f32[128,128], index: 4, kind: output, shape index: {}]  }
   0x1 LB: > { %s541_s16 = sadd.s32 4294967295, %s678_s15   ;;  %p545_p0 = scmp.ge.s32.totalorder %s678_s15, 1  ;;  %s678_s15 = sphi %s706_s15, %s14_s15  }
   0x2   : > { %p164_p1 = scmp.lt.s32.totalorder %s678_s15, 3 }
   0x4   : > { %p165_p2 = pnand %p545_p0, %p164_p1 }
   0x5   : > { %v644_v0 = vld [vmem:[%s813_s1 + $0x40] sm:$0xff] (!%p165_p2)   ;;  %s546_s19 = sshll.u32 (!%p165_p2), %s541_s16, 3  ;;  %v646_v2 = vld [vmem:[%s813_s1 + $0x48] sm:$0xff] (!%p165_p2)   ;;  %v648_v4 = vld [vmem:[%s813_s1 + $0x50] sm:$0xff] (!%p165_p2)   ;;  %v464_v24 = vlaneseq (!%p165_p2)  ;;  %v680_v28 = vmov (!%p165_p2), 0  }
   0x6   : > { %168 = sbr.rel (%p165_p2) target bundleno = 269 (0x10d), region = 36  ;;  %v645_v1 = vld [vmem:[%s813_s1] sm:$0xff] (!%p165_p2)   ;;  %579 = vmatprep.subr.bf16.mxu0 (!%p165_p2), %v644_v0  ;;  %619 = vmatprep.subr.bf16.mxu1 (!%p165_p2), %v644_v0  ;;  %v647_v3 = vld [vmem:[%s813_s1 + $0x8] sm:$0xff] (!%p165_p2)   ;;  %p192_p3 = scmp.lt.s32.totalorder (!%p165_p2), %s546_s19, 15  ;;  %v649_v5 = vld [vmem:[%s813_s1 + $0x10] sm:$0xff] (!%p165_p2)  }
   0x7   : > { %580 = vmatpush3.bf16.msra.mxu0 (!%p165_p2), %v645_v1  ;;  %627 = vmatpush3.bf16.msra.mxu1 (!%p165_p2), %v645_v1  ;;  %v650_v6 = vld [vmem:[%s813_s1 + $0x58] sm:$0xff] (!%p165_p2)   ;;  %v652_v8 = vld [vmem:[%s813_s1 + $0x60] sm:$0xff] (!%p165_p2)   ;;  %v654_v10 = vld [vmem:[%s813_s1 + $0x68] sm:$0xff] (!%p165_p2)   ;;  %v465_v26 = vshrl.u32 (!%p165_p2), %v464_v24, 7 }
   0x8   : > { %581 = vmatprep.subr.bf16.mxu0 (!%p165_p2), %v646_v2  ;;  %620 = vmatprep.subr.bf16.mxu1 (!%p165_p2), %v646_v2  ;;  %v651_v7 = vld [vmem:[%s813_s1 + $0x18] sm:$0xff] (!%p165_p2)   ;;  %v653_v9 = vld [vmem:[%s813_s1 + $0x20] sm:$0xff] (!%p165_p2)   ;;  %v655_v13 = vld [vmem:[%s813_s1 + $0x28] sm:$0xff] (!%p165_p2)  }
   0x9   : > { %v656_v14 = vld [vmem:[%s813_s1 + $0x70] sm:$0xff] (!%p165_p2)   ;;  %v658_v16 = vld [vmem:[%s813_s1 + $0x78] sm:$0xff] (!%p165_p2)   ;;  %v453_v25 = vld [vmem:[%s815_s3] sm:$0x1] (!%p165_p2)  ;;  %v466_v27 = vsub.s32 (!%p165_p2), 0, %v465_v26 }
   0xa   : > { %v657_v15 = vld [vmem:[%s813_s1 + $0x30] sm:$0xff] (!%p165_p2)   ;;  %v659_v17 = vld [vmem:[%s813_s1 + $0x38] sm:$0xff] (!%p165_p2)   ;;  %vm454_vm0 = vcmp.gt.f32.partialorder (!%p165_p2), %v453_v25, 0.0  ;;  %v551_v32 = vld [vmem:[%s814_s2] ss:$0 sm:$0xff] (!%p165_p2) }
   0xb   : > { %582 = vmatpush3.bf16.msra.mxu0 (!%p165_p2), %v647_v3  ;;  %628 = vmatpush3.bf16.msra.mxu1 (!%p165_p2), %v647_v3  ;;  %v463_v29 = vsel (!%p165_p2), %vm454_vm0, 1, %v680_v28 }
   0xc   : > { %583 = vmatprep.subr.bf16.mxu0 (!%p165_p2), %v648_v4  ;;  %621 = vmatprep.subr.bf16.mxu1 (!%p165_p2), %v648_v4  ;;  %v467_v34 = vrot.slane (!%p165_p2), %v463_v29, %v466_v27 }
   0xd   : > { %s818_s19 = smov (!%p192_p3, %s546_s19), 15 }
   0xe   : > { %s578_s8 = sshll.u32 %s818_s19, 3  ;;  %vm468_vm1 = vcmp.eq.s32.totalorder %v467_v34, 1 }
   0xf   : > { %584 = vmatpush3.bf16.msra.mxu0 %v649_v5  ;;  %629 = vmatpush3.bf16.msra.mxu1 %v649_v5  ;;  %s749_s13 = scalar_lea.vmem %s812_s0, %s578_s8  ;;  %s791_s11 = scalar_lea.vmem %s816_s4, %s578_s8 }
  0x10   : > { %585 = vmatprep.subr.bf16.mxu0 %v650_v6  ;;  %622 = vmatprep.subr.bf16.mxu1 %v650_v6  ;;  %v662_v11 = vld [vmem:[%s749_s13 + $0x4] ss:$8 sps:$4 sm:$0xff]   ;;  %v660_v18 = vld [vmem:[%s749_s13] ss:$8 sps:$4 sm:$0xff]   ;;  %v666_v20 = vld [vmem:[%s749_s13 + $0x14] ss:$8 sps:$4 sm:$0xff]  }
  0x11   : > { %v665_v12 = vld [vmem:[%s749_s13 + $0x24] ss:$8 sps:$4 sm:$0xff]   ;;  %420 = vmatprep.mubr.bf16.mxu0 %v662_v11  ;;  %v663_v19 = vld [vmem:[%s749_s13 + $0x20] ss:$8 sps:$4 sm:$0xff]   ;;  %v668_v21 = vld [vmem:[%s749_s13 + $0x34] ss:$8 sps:$4 sm:$0xff]  }
  0x12   : > { %436 = vmatprep.mubr.bf16.mxu1 %v665_v12  ;;  %v670_v22 = vld [vmem:[%s749_s13 + $0x10] ss:$8 sps:$4 sm:$0xff]  }
  0x13   : > { %586 = vmatpush3.bf16.msra.mxu0 %v651_v7  ;;  %630 = vmatpush3.bf16.msra.mxu1 %v651_v7  ;;  %v671_v23 = vld [vmem:[%s749_s13 + $0x30] ss:$8 sps:$4 sm:$0xff]  }
  0x14   : > { %587 = vmatprep.subr.bf16.mxu0 %v652_v8  ;;  %623 = vmatprep.subr.bf16.mxu1 %v652_v8 }
  0x17   : > { %588 = vmatpush3.bf16.msra.mxu0 %v653_v9  ;;  %631 = vmatpush3.bf16.msra.mxu1 %v653_v9 }
  0x18   : > { %589 = vmatprep.subr.bf16.mxu0 %v654_v10  ;;  %624 = vmatprep.subr.bf16.mxu1 %v654_v10 }
  0x1b   : > { %590 = vmatpush3.bf16.msra.mxu0 %v655_v13  ;;  %632 = vmatpush3.bf16.msra.mxu1 %v655_v13 }
  0x1c   : > { %591 = vmatprep.subr.bf16.mxu0 %v656_v14  ;;  %625 = vmatprep.subr.bf16.mxu1 %v656_v14 }
  0x1f   : > { %592 = vmatpush3.bf16.msra.mxu0 %v657_v15  ;;  %633 = vmatpush3.bf16.msra.mxu1 %v657_v15 }
  0x20   : > { %593 = vmatprep.subr.bf16.mxu0 %v658_v16  ;;  %626 = vmatprep.subr.bf16.mxu1 %v658_v16 }
  0x23   : > { %594 = vmatpush3.bf16.msra.mxu0 %v659_v17  ;;  %634 = vmatpush3.bf16.msra.mxu1 %v659_v17 }
  0x26   : > { %421 = vmatmul.mubr.bf16.vlgmr.msra.gmra.mrb[0].mxu0 %v660_v18  ;;  %437 = vmatmul.mubr.bf16.vlgmr.msra.gmra.mrb[0].mxu1 %v663_v19 }
  0x27   : > { %428 = vmatprep.mubr.bf16.mxu0 %v666_v20  ;;  %444 = vmatprep.mubr.bf16.mxu1 %v668_v21 }
  0x2e   : > { %429 = vmatmul.mubr.bf16.gmra.mrb[4].mxu0 %v670_v22  ;;  %445 = vmatmul.mubr.bf16.gmra.mrb[4].mxu1 %v671_v23 }
  0xf9   : > { %v595_v30 = vpop.f32.mrb[0].mxu0  ;;  %v607_v31 = vpop.f32.mrb[0].mxu1 }
  0xfa   : > { %v596_v33 = vpop.f32.mrb[1].mxu0  ;;  %v608_v35 = vpop.f32.mrb[1].mxu1 }
  0xfb   : > { %v597_v36 = vadd.f32 %v596_v33, %v595_v30  ;;  %v609_v37 = vadd.f32 %v608_v35, %v607_v31  ;;  %v598_v38 = vpop.f32.mrb[2].mxu0  ;;  %v610_v39 = vpop.f32.mrb[2].mxu1 }
  0xfc   : > { %v599_v40 = vpop.f32.mrb[3].mxu0  ;;  %v611_v41 = vpop.f32.mrb[3].mxu1 }
  0xfd   : > { %v423_v42 = vadd.f32 %v597_v36, %v551_v32  ;;  %v439_v43 = vadd.f32 %v609_v37, %v551_v32  ;;  %v600_v44 = vadd.f32 %v599_v40, %v598_v38  ;;  %v612_v45 = vadd.f32 %v611_v41, %v610_v39 }
  0xff   : > { %v455_v46 = vmax.f32 %v423_v42, 0.0  ;;  %v459_v47 = vmax.f32 %v439_v43, 0.0  ;;  %v426_v48 = vadd.f32 %v600_v44, %v551_v32  ;;  %v442_v49 = vadd.f32 %v612_v45, %v551_v32 }
 0x101   : > { %v469_v50 = vsel %vm468_vm1, %v455_v46, %v423_v42  ;;  %v473_v51 = vsel %vm468_vm1, %v459_v47, %v439_v43  ;;  %v456_v52 = vmax.f32 %v426_v48, 0.0  ;;  %v460_v53 = vmax.f32 %v442_v49, 0.0  ;;  %v601_v54 = vpop.f32.mrb[4].mxu0  ;;  %v613_v55 = vpop.f32.mrb[4].mxu1 }
 0x102   : > { %477 = vst [vmem:[%s791_s11] sm:$0xff] %v469_v50  ;;  %481 = vst [vmem:[%s791_s11 + $0x20] sm:$0xff] %v473_v51  ;;  %v602_v56 = vpop.f32.mrb[5].mxu0  ;;  %v614_v57 = vpop.f32.mrb[5].mxu1 }
 0x103   : > { %v470_v58 = vsel %vm468_vm1, %v456_v52, %v426_v48  ;;  %v474_v59 = vsel %vm468_vm1, %v460_v53, %v442_v49  ;;  %v603_v60 = vadd.f32 %v602_v56, %v601_v54  ;;  %v615_v61 = vadd.f32 %v614_v57, %v613_v55  ;;  %v604_v62 = vpop.f32.mrb[6].mxu0  ;;  %v616_v63 = vpop.f32.mrb[6].mxu1 }
 0x104   : > { %478 = vst [vmem:[%s791_s11 + $0x8] sm:$0xff] %v470_v58  ;;  %482 = vst [vmem:[%s791_s11 + $0x28] sm:$0xff] %v474_v59  ;;  %v605_v0 = vpop.f32.mrb[7].mxu0  ;;  %v617_v1 = vpop.f32.mrb[7].mxu1 }
 0x105   : > { %v431_v2 = vadd.f32 %v603_v60, %v551_v32  ;;  %v447_v3 = vadd.f32 %v615_v61, %v551_v32  ;;  %v606_v4 = vadd.f32 %v605_v0, %v604_v62  ;;  %v618_v5 = vadd.f32 %v617_v1, %v616_v63 }
 0x107   : > { %v457_v6 = vmax.f32 %v431_v2, 0.0  ;;  %v461_v7 = vmax.f32 %v447_v3, 0.0  ;;  %v434_v8 = vadd.f32 %v606_v4, %v551_v32  ;;  %v450_v9 = vadd.f32 %v618_v5, %v551_v32 }
 0x109   : > { %v471_v10 = vsel %vm468_vm1, %v457_v6, %v431_v2  ;;  %v475_v11 = vsel %vm468_vm1, %v461_v7, %v447_v3  ;;  %v458_v12 = vmax.f32 %v434_v8, 0.0  ;;  %v462_v13 = vmax.f32 %v450_v9, 0.0 }
 0x10a   : > { %479 = vst [vmem:[%s791_s11 + $0x10] sm:$0xff] %v471_v10  ;;  %483 = vst [vmem:[%s791_s11 + $0x30] sm:$0xff] %v475_v11 }
 0x10b   : > { %v472_v14 = vsel %vm468_vm1, %v458_v12, %v434_v8  ;;  %v476_v15 = vsel %vm468_vm1, %v462_v13, %v450_v9 }
 0x10c   : > { %480 = vst [vmem:[%s791_s11 + $0x18] sm:$0xff] %v472_v14  ;;  %484 = vst [vmem:[%s791_s11 + $0x38] sm:$0xff] %v476_v15 }
 0x10d PF: > { %s14_s15 = sadd.s32 1, %s678_s15  }
 0x10e   : > { %p11_p4 = scmp.ge.s32.totalorder %s14_s15, 4  }
 0x110   :  { %13 = sbr.rel (!%p11_p4) target bundleno = 1 (0x1), region = 66 }

// kernel: _lambda_.9
= control target key start
LH: loop header
LB: loop body
LE: loop exit
PB: predicated region body
PF: predicated region fallthrough
CT: control target
= control target key end

     0   :  { %s962_s15 = smov 0   ;;  %s1096_s0 = inlined_call_operand.vmem [shape: bf16[128,384], index: 0, kind: input, shape index: {}]   ;;  %s1097_s1 = inlined_call_operand.vmem [shape: bf16[384,128], index: 1, kind: input, shape index: {}]   ;;  %s1098_s2 = inlined_call_operand.vmem [shape: f32[1,128], index: 2, kind: input, shape index: {}]   ;;  %s1099_s3 = inlined_call_operand.vmem [shape: bf16[128,128], index: 3, kind: input, shape index: {}]   ;;  %s1100_s4 = inlined_call_operand.vmem [shape: f32[2,1,128], index: 4, kind: output, shape index: {}]  }
   0x1 LB: > { %s968_s16 = sadd.s32 4294967295, %s935_s15   ;;  %p741_p0 = scmp.ge.s32.totalorder %s935_s15, 1  ;;  %s935_s15 = sphi %s962_s15, %s14_s15  }
   0x2   : > { %p175_p1 = scmp.lt.s32.totalorder %s935_s15, 3 }
   0x4   : > { %p176_p2 = pnand %p741_p0, %p175_p1 }
   0x5   : > { %v889_v0 = vld [vmem:[%s1097_s1 + $0x40] sm:$0xff] (!%p176_p2)   ;;  %v891_v2 = vld [vmem:[%s1097_s1 + $0x48] sm:$0xff] (!%p176_p2)   ;;  %v894_v5 = vld [vmem:[%s1097_s1 + $0x50] sm:$0xff] (!%p176_p2)   ;;  %s742_s5 = sshll.u32 (!%p176_p2), %s968_s16, 3  ;;  %p218_p4 = scmp.lt.s32.totalorder (!%p176_p2), %s968_s16, 1 }
   0x6   : > { %179 = sbr.rel (%p176_p2) target bundleno = 304 (0x130), region = 36  ;;  %v890_v1 = vld [vmem:[%s1097_s1] sm:$0xff] (!%p176_p2)   ;;  %804 = vmatprep.subr.bf16.mxu0 (!%p176_p2), %v889_v0  ;;  %v893_v4 = vld [vmem:[%s1097_s1 + $0x8] sm:$0xff] (!%p176_p2)   ;;  %v896_v7 = vld [vmem:[%s1097_s1 + $0x10] sm:$0xff] (!%p176_p2)   ;;  %p206_p3 = scmp.lt.s32.totalorder (!%p176_p2), %s742_s5, 15 }
   0x7   : > { %805 = vmatpush3.bf16.msra.mxu0 (!%p176_p2), %v890_v1  ;;  %v892_v3 = vld [vmem:[%s1097_s1 + $0x80] sm:$0xff] (!%p176_p2)   ;;  %v895_v6 = vld [vmem:[%s1097_s1 + $0x88] sm:$0xff] (!%p176_p2)   ;;  %v897_v8 = vld [vmem:[%s1097_s1 + $0x58] sm:$0xff] (!%p176_p2)  }
   0x8   : > { %806 = vmatprep.subr.bf16.mxu0 (!%p176_p2), %v891_v2  ;;  %856 = vmatprep.subr.bf16.mxu1 (!%p176_p2), %v892_v3  ;;  %v898_v9 = vld [vmem:[%s1097_s1 + $0x90] sm:$0xff] (!%p176_p2)   ;;  %v899_v10 = vld [vmem:[%s1097_s1 + $0x18] sm:$0xff] (!%p176_p2)   ;;  %v900_v11 = vld [vmem:[%s1097_s1 + $0x60] sm:$0xff] (!%p176_p2)  }
   0x9   : > { %857 = vmatpush3.bf16.msra.mxu1 (!%p176_p2), %v892_v3  ;;  %v901_v12 = vld [vmem:[%s1097_s1 + $0x98] sm:$0xff] (!%p176_p2)   ;;  %v902_v13 = vld [vmem:[%s1097_s1 + $0x20] sm:$0xff] (!%p176_p2)   ;;  %v903_v15 = vld [vmem:[%s1097_s1 + $0x68] sm:$0xff] (!%p176_p2)  }
   0xa   : > { %858 = vmatprep.subr.bf16.mxu1 (!%p176_p2), %v895_v6  ;;  %v904_v14 = vld [vmem:[%s1097_s1 + $0xa0] sm:$0xff] (!%p176_p2)   ;;  %v905_v16 = vld [vmem:[%s1097_s1 + $0x28] sm:$0xff] (!%p176_p2)   ;;  %v906_v18 = vld [vmem:[%s1097_s1 + $0x70] sm:$0xff] (!%p176_p2)  }
   0xb   : > { %807 = vmatpush3.bf16.msra.mxu0 (!%p176_p2), %v893_v4  ;;  %v907_v17 = vld [vmem:[%s1097_s1 + $0xa8] sm:$0xff] (!%p176_p2)   ;;  %v908_v19 = vld [vmem:[%s1097_s1 + $0x30] sm:$0xff] (!%p176_p2)   ;;  %v909_v20 = vld [vmem:[%s1097_s1 + $0x78] sm:$0xff] (!%p176_p2)  }
   0xc   : > { %808 = vmatprep.subr.bf16.mxu0 (!%p176_p2), %v894_v5  ;;  %v910_v21 = vld [vmem:[%s1097_s1 + $0xb0] sm:$0xff] (!%p176_p2)   ;;  %v911_v23 = vld [vmem:[%s1097_s1 + $0x38] sm:$0xff] (!%p176_p2)   ;;  %v1074_v38 = vld [vmem:[%s1098_s2] ss:$0 sm:$0xff] (!%p176_p2) }
   0xd   : > { %859 = vmatpush3.bf16.msra.mxu1 %v895_v6  ;;  %s1102_s5 = smov (!%p206_p3, %s742_s5), 15  ;;  %v915_v25 = vld [vmem:[%s1097_s1 + $0xb8] sm:$0xff]   ;;  %s1104_s16 = smov (!%p218_p4, %s968_s16), 1 }
   0xe   : > { %860 = vmatprep.subr.bf16.mxu1 %v898_v9  ;;  %s880_s26 = smul.u32 12, %s1102_s5  ;;  %s745_s23 = sshll.u32 %s1102_s5, 2 }
   0xf   : > { %809 = vmatpush3.bf16.msra.mxu0 %v896_v7  ;;  %s220_s30 = scalar_lea.vmem %s1100_s4, %s1104_s16 }
  0x10   : > { %810 = vmatprep.subr.bf16.mxu0 %v897_v8  ;;  %s1039_s12 = scalar_lea.vmem %s1096_s0, %s880_s26  ;;  %s1069_s26 = scalar_lea.vmem %s1099_s3, %s745_s23 }
  0x11   : > { %861 = vmatpush3.bf16.msra.mxu1 %v898_v9  ;;  %v914_v22 = vld [vmem:[%s1039_s12 + $0x4] ss:$12 sps:$4 sm:$0xff]   ;;  %v916_v24 = vld [vmem:[%s1039_s12 + $0x8] ss:$12 sps:$4 sm:$0xff]   ;;  %v912_v26 = vld [vmem:[%s1039_s12] ss:$12 sps:$4 sm:$0xff]  }
  0x12   : > { %862 = vmatprep.subr.bf16.mxu1 %v901_v12  ;;  %533 = vmatprep.mubr.bf16.mxu0 %v914_v22  ;;  %v918_v27 = vld [vmem:[%s1039_s12 + $0x1c] ss:$12 sps:$4 sm:$0xff]   ;;  %v917_v28 = vld [vmem:[%s1039_s12 + $0x20] ss:$12 sps:$4 sm:$0xff]   ;;  %v924_v29 = vld [vmem:[%s1039_s12 + $0x38] ss:$12 sps:$4 sm:$0xff]  }
  0x13   : > { %811 = vmatpush3.bf16.msra.mxu0 %v899_v10  ;;  %872 = vmatprep.mubr.bf16.mxu1 %v916_v24  ;;  %v920_v30 = vld [vmem:[%s1039_s12 + $0x18] ss:$12 sps:$4 sm:$0xff]   ;;  %v921_v31 = vld [vmem:[%s1039_s12 + $0x34] ss:$12 sps:$4 sm:$0xff]   ;;  %v925_v32 = vld [vmem:[%s1039_s12 + $0x50] ss:$12 sps:$4 sm:$0xff]  }
  0x14   : > { %812 = vmatprep.subr.bf16.mxu0 %v900_v11  ;;  %v923_v33 = vld [vmem:[%s1039_s12 + $0x30] ss:$12 sps:$4 sm:$0xff]   ;;  %v926_v34 = vld [vmem:[%s1039_s12 + $0x4c] ss:$12 sps:$4 sm:$0xff]   ;;  %v928_v35 = vld [vmem:[%s1039_s12 + $0x48] ss:$12 sps:$4 sm:$0xff]  }
  0x15   : > { %863 = vmatpush3.bf16.msra.mxu1 %v901_v12  ;;  %v786_v39 = vld [vmem:[%s1069_s26] sm:$0xff]   ;;  %v801_v56 = vld [vmem:[%s1069_s26 + $0x8] sm:$0xff]  }
  0x16   : > { %864 = vmatprep.subr.bf16.mxu1 %v904_v14  ;;  %v787_v47 = vunpack.c.l.bf16 %v786_v39  ;;  %v788_v52 = vunpack.c.h.bf16 %v786_v39  ;;  %v791_v61 = vunpack.c.l.bf16 %v801_v56  ;;  %v792_v9 = vunpack.c.h.bf16 %v801_v56 }
  0x17   : > { %813 = vmatpush3.bf16.msra.mxu0 %v902_v13 }
  0x18   : > { %814 = vmatprep.subr.bf16.mxu0 %v903_v15 }
  0x19   : > { %865 = vmatpush3.bf16.msra.mxu1 %v904_v14  ;;  %v802_v14 = vld [vmem:[%s1069_s26 + $0x10] sm:$0xff]  }
  0x1a   : > { %866 = vmatprep.subr.bf16.mxu1 %v907_v17 }
  0x1b   : > { %815 = vmatpush3.bf16.msra.mxu0 %v905_v16 }
  0x1c   : > { %816 = vmatprep.subr.bf16.mxu0 %v906_v18 }
  0x1d   : > { %867 = vmatpush3.bf16.msra.mxu1 %v907_v17 }
  0x1e   : > { %868 = vmatprep.subr.bf16.mxu1 %v910_v21 }
  0x1f   : > { %817 = vmatpush3.bf16.msra.mxu0 %v908_v19 }
  0x20   : > { %818 = vmatprep.subr.bf16.mxu0 %v909_v20 }
  0x21   : > { %869 = vmatpush3.bf16.msra.mxu1 %v910_v21  ;;  %v795_v21 = vunpack.c.l.bf16 %v802_v14 }
  0x22   : > { %870 = vmatprep.subr.bf16.mxu1 %v915_v25 }
  0x23   : > { %819 = vmatpush3.bf16.msra.mxu0 %v911_v23 }
  0x25   : > { %871 = vmatpush3.bf16.msra.mxu1 %v915_v25 }
  0x26   : > { %534 = vmatmul.mubr.bf16.vlgmr.msra.gmra.mrb[0].mxu0 %v912_v26 }
  0x27   : > { %541 = vmatprep.mubr.bf16.mxu0 %v918_v27 }
  0x28   : > { %873 = vmatmul.mubr.bf16.vlgmr.msra.gmra.mrb[0].mxu1 %v917_v28 }
  0x29   : > { %876 = vmatprep.mubr.bf16.mxu1 %v924_v29  ;;  %v796_v29 = vunpack.c.h.bf16 %v802_v14 }
  0x2e   : > { %542 = vmatmul.mubr.bf16.gmra.mrb[4].mxu0 %v920_v30 }
  0x2f   : > { %549 = vmatprep.mubr.bf16.mxu0 %v921_v31 }
  0x30   : > { %877 = vmatmul.mubr.bf16.gmra.mrb[4].mxu1 %v925_v32 }
  0x36   : > { %550 = vmatmul.mubr.bf16.gmra.mrb[8].mxu0 %v923_v33  ;;  %v803_v33 = vld [vmem:[%s1069_s26 + $0x18] sm:$0xff]  }
  0x37   : > { %557 = vmatprep.mubr.bf16.mxu0 %v926_v34 }
  0x3e   : > { %558 = vmatmul.mubr.bf16.gmra.mrb[12].mxu0 %v928_v35 }
  0xf9   : > { %v820_v36 = vpop.f32.mrb[0].mxu0 }
  0xfa   : > { %v821_v37 = vpop.f32.mrb[1].mxu0 }
  0xfb   : > { %v822_v40 = vadd.f32 %v821_v37, %v820_v36  ;;  %v823_v41 = vpop.f32.mrb[2].mxu0  ;;  %v874_v43 = vpop.f32.mrb[0].mxu1 }
  0xfc   : > { %v824_v42 = vpop.f32.mrb[3].mxu0  ;;  %v600_v46 = vpop.f32.mrb[1].mxu1 }
  0xfd   : > { %v825_v44 = vadd.f32 %v824_v42, %v823_v41  ;;  %v536_v45 = vadd.f32 %v822_v40, %v1074_v38  ;;  %v875_v48 = vpop.f32.mrb[2].mxu1  ;;  %v799_v40 = vunpack.c.l.bf16 %v803_v33 }
  0xfe   : > { %v603_v51 = vpop.f32.mrb[3].mxu1 }
  0xff   : > { %v601_v49 = vadd.f32 %v600_v46, %v536_v45  ;;  %v539_v50 = vadd.f32 %v825_v44, %v1074_v38 }
 0x101   : > { %v647_v53 = vadd.f32 %v787_v47, %v601_v49  ;;  %v604_v54 = vadd.f32 %v603_v51, %v539_v50  ;;  %v826_v55 = vpop.f32.mrb[4].mxu0  ;;  %v800_v49 = vunpack.c.h.bf16 %v803_v33 }
 0x102   : > { %v827_v57 = vpop.f32.mrb[5].mxu0 }
 0x103   : > { %v648_v58 = vadd.f32 %v788_v52, %v604_v54  ;;  %v828_v59 = vadd.f32 %v827_v57, %v826_v55  ;;  %v829_v60 = vpop.f32.mrb[6].mxu0  ;;  %v878_v63 = vpop.f32.mrb[4].mxu1  ;;  %v655_v0 = vmax.f32 %v647_v53, 0.0 }
 0x104   : > { %v830_v62 = vpop.f32.mrb[7].mxu0  ;;  %v616_v4 = vpop.f32.mrb[5].mxu1 }
 0x105   : > { %v656_v1 = vmax.f32 %v648_v58, 0.0  ;;  %v544_v2 = vadd.f32 %v828_v59, %v1074_v38  ;;  %v831_v3 = vadd.f32 %v830_v62, %v829_v60  ;;  %v879_v5 = vpop.f32.mrb[6].mxu1 }
 0x106   : > { %v619_v10 = vpop.f32.mrb[7].mxu1 }
 0x107   : > { %v663_v6 = vadd.f32 %v656_v1, %v655_v0  ;;  %v609_v7 = vadd.f32 %v874_v43, %v544_v2  ;;  %v547_v8 = vadd.f32 %v831_v3, %v1074_v38 }
 0x109   : > { %v649_v11 = vadd.f32 %v791_v61, %v609_v7  ;;  %v612_v12 = vadd.f32 %v875_v48, %v547_v8  ;;  %v832_v13 = vpop.f32.mrb[8].mxu0 }
 0x10a   : > { %v833_v15 = vpop.f32.mrb[9].mxu0 }
 0x10b   : > { %v657_v16 = vmax.f32 %v649_v11, 0.0  ;;  %v650_v17 = vadd.f32 %v792_v9, %v612_v12  ;;  %v834_v18 = vadd.f32 %v833_v15, %v832_v13  ;;  %v835_v19 = vpop.f32.mrb[10].mxu0 }
 0x10c   : > { %v836_v20 = vpop.f32.mrb[11].mxu0 }
 0x10d   : > { %v658_v22 = vmax.f32 %v650_v17, 0.0  ;;  %v837_v23 = vadd.f32 %v836_v20, %v835_v19  ;;  %v552_v24 = vadd.f32 %v834_v18, %v1074_v38  ;;  %v664_v25 = vadd.f32 %v663_v6, %v657_v16 }
 0x10f   : > { %v617_v26 = vadd.f32 %v616_v4, %v552_v24  ;;  %v665_v27 = vadd.f32 %v664_v25, %v658_v22  ;;  %v555_v28 = vadd.f32 %v837_v23, %v1074_v38 }
 0x111   : > { %v651_v30 = vadd.f32 %v795_v21, %v617_v26  ;;  %v620_v31 = vadd.f32 %v619_v10, %v555_v28  ;;  %v838_v32 = vpop.f32.mrb[12].mxu0 }
 0x112   : > { %v839_v34 = vpop.f32.mrb[13].mxu0 }
 0x113   : > { %v659_v35 = vmax.f32 %v651_v30, 0.0  ;;  %v652_v36 = vadd.f32 %v796_v29, %v620_v31  ;;  %v840_v37 = vadd.f32 %v839_v34, %v838_v32  ;;  %v841_v39 = vpop.f32.mrb[14].mxu0 }
 0x114   : > { %v842_v41 = vpop.f32.mrb[15].mxu0 }
 0x115   : > { %v666_v42 = vadd.f32 %v665_v27, %v659_v35  ;;  %v660_v43 = vmax.f32 %v652_v36, 0.0  ;;  %v560_v44 = vadd.f32 %v840_v37, %v1074_v38  ;;  %v843_v45 = vadd.f32 %v842_v41, %v841_v39 }
 0x117   : > { %v667_v46 = vadd.f32 %v666_v42, %v660_v43  ;;  %v625_v47 = vadd.f32 %v878_v63, %v560_v44  ;;  %v563_v48 = vadd.f32 %v843_v45, %v1074_v38 }
 0x119   : > { %v653_v50 = vadd.f32 %v799_v40, %v625_v47  ;;  %v628_v51 = vadd.f32 %v879_v5, %v563_v48 }
 0x11b   : > { %v661_v52 = vmax.f32 %v653_v50, 0.0  ;;  %v654_v53 = vadd.f32 %v800_v49, %v628_v51 }
 0x11d   : > { %v668_v54 = vadd.f32 %v667_v46, %v661_v52  ;;  %v662_v55 = vmax.f32 %v654_v53, 0.0 }
 0x11f   : > { %v669_v56 = vadd.f32 %v668_v54, %v662_v55 }
 0x121   : > { %v670_v57 = vrot.slane %v669_v56, 4 }
 0x123   : > { %v671_v58 = vadd.f32 %v670_v57, %v669_v56 }
 0x125   : > { %v672_v59 = vrot.slane %v671_v58, 2 }
 0x127   : > { %v673_v60 = vadd.f32 %v672_v59, %v671_v58 }
 0x129   : > { %v674_v61 = vrot.slane %v673_v60, 1 }
 0x12b   : > { %v675_v62 = vadd.f32 %v674_v61, %v673_v60 }
 0x12d   : > { %v676_v38 = vmul.f32 0.015625, %v675_v62 }
 0x12f   : > { %677 = vst [vmem:[%s220_s30] sm:$0x1] %v676_v38 }
 0x130 PF: > { %s14_s15 = sadd.s32 1, %s935_s15  }
 0x131   : > { %p11_p5 = scmp.ge.s32.totalorder %s14_s15, 4  }
 0x133   :  { %13 = sbr.rel (!%p11_p5) target bundleno = 1 (0x1), region = 69 }

</bundles_post_ra>
